<compile_context>
chip_gen: v5e
topology: v5e:2x2
jax: 0.10.0
libtpu: 0.0.40
codegen_flags: <defaults>
</compile_context>

<pallas_src>
import jax
import jax.numpy as jnp
from jax.experimental import pallas as pl
from jax.experimental.pallas import tpu as pltpu

IN_DIM = 28 * 28        # 784; block last dim == full array dim, so legal as-is
H1, H1_PAD = 500, 512   # padded to lane multiples (128)
H2, H2_PAD = 300, 384
C_PAD = 128             # logits padded to one full lane tile (lane-dense store)


def mlp_kernel(x_ref, w1_ref, b1_ref, w2_ref, b2_ref, w3_ref, b3_ref, o_ref):
    # fc1 + relu (fc1_drop is identity in eval mode): bf16 operands, f32 acc.
    h1 = jnp.dot(x_ref[...], w1_ref[...], preferred_element_type=jnp.float32)
    h1 = jnp.maximum(h1 + b1_ref[...], 0.0)
    # fc2 + relu (fc2_drop is identity in eval mode)
    h2 = jnp.dot(h1.astype(jnp.bfloat16), w2_ref[...],
                 preferred_element_type=jnp.float32)
    h2 = jnp.maximum(h2 + b2_ref[...], 0.0)
    # fc3 (no activation; labels=False so no softmax)
    out = jnp.dot(h2.astype(jnp.bfloat16), w3_ref[...],
                  preferred_element_type=jnp.float32)
    o_ref[...] = (out + b3_ref[...]).astype(o_ref.dtype)


def _pick_tb(B):
    """Pick batch tile: big enough to amortize per-step overhead / fill the
    MXU, but keep >= 2 grid steps when possible so v7x can shard the batch
    axis across both TensorCores."""
    for tb in (512, 256, 128):
        if B >= 2 * tb:
            return tb
    if B > 256:
        return 256
    if B > 128:
        return 128
    # Tiny batches: one small sublane-aligned tile, minimal padding.
    return max(8, pl.cdiv(B, 8) * 8)


def mlp_forward(x, packed_params, num_classes):
    """x: (B, 1, 28, 28) or (B, 784) float32.  Returns (B, num_classes) f32."""
    w1, b1, w2, b2, w3, b3 = packed_params
    # glue: x.view(-1, 784); cast to bf16 here (fused with reshape/pad) so the
    # streamed HBM traffic is halved vs. f32.
    x2d = x.reshape(-1, IN_DIM).astype(jnp.bfloat16)
    B = x2d.shape[0]
    TB = _pick_tb(B)
    Bp = pl.cdiv(B, TB) * TB
    if Bp != B:
        x2d = jnp.pad(x2d, ((0, Bp - B), (0, 0)))       # pad rows to tile mult

    resident = lambda shape: pl.BlockSpec(shape, lambda i: (0, 0))

    out = pl.pallas_call(
        mlp_kernel,
        out_shape=jax.ShapeDtypeStruct((Bp, C_PAD), jnp.float32),
        grid_spec=pltpu.PrefetchScalarGridSpec(
            num_scalar_prefetch=0,
            grid=(Bp // TB,),
            in_specs=[
                pl.BlockSpec((TB, IN_DIM), lambda i: (i, 0)),   # streamed bf16 x
                resident((IN_DIM, H1_PAD)), resident((1, H1_PAD)),
                resident((H1_PAD, H2_PAD)), resident((1, H2_PAD)),
                resident((H2_PAD, C_PAD)),  resident((1, C_PAD)),
            ],
            out_specs=pl.BlockSpec((TB, C_PAD), lambda i: (i, 0)),
        ),
        compiler_params=pltpu.CompilerParams(
            dimension_semantics=("parallel",),
            vmem_limit_bytes=16 * 1024 * 1024),
    )(x2d, w1, b1, w2, b2, w3, b3)

    return out[:B, :num_classes]


def init_params(key, num_classes):
    """nn.Linear-style init; weights stored (in, out), f32, unpadded."""
    ks = jax.random.split(key, 6)

    def linear(kw, kb, fan_in, fan_out):
        bound = 1.0 / jnp.sqrt(fan_in)
        w = jax.random.uniform(kw, (fan_in, fan_out), jnp.float32, -bound, bound)
        b = jax.random.uniform(kb, (1, fan_out), jnp.float32, -bound, bound)
        return w, b

    w1, b1 = linear(ks[0], ks[1], IN_DIM, H1)
    w2, b2 = linear(ks[2], ks[3], H1, H2)
    w3, b3 = linear(ks[4], ks[5], H2, num_classes)
    return (w1, b1, w2, b2, w3, b3)


def pack_params(params):
    """Zero-pad feature dims to lane multiples and cast weights to bf16."""
    w1, b1, w2, b2, w3, b3 = params

    def pad2(a, rows, cols):
        return jnp.pad(a, ((0, rows - a.shape[0]), (0, cols - a.shape[1])))

    w1p = pad2(w1, IN_DIM, H1_PAD).astype(jnp.bfloat16)
    b1p = pad2(b1, 1, H1_PAD)
    w2p = pad2(w2, H1_PAD, H2_PAD).astype(jnp.bfloat16)
    b2p = pad2(b2, 1, H2_PAD)
    w3p = pad2(w3, H2_PAD, C_PAD).astype(jnp.bfloat16)
    b3p = pad2(b3, 1, C_PAD)
    return (w1p, b1p, w2p, b2p, w3p, b3p)


def ref_forward(x, params):
    """Plain-JAX reference mirroring the kernel's bf16-matmul / f32-acc path."""
    w1, b1, w2, b2, w3, b3 = params
    bf = lambda a: a.astype(jnp.bfloat16).astype(jnp.float32)
    x2d = x.reshape(-1, IN_DIM)
    h1 = jnp.maximum(jnp.dot(bf(x2d), bf(w1)) + b1, 0.0)
    h2 = jnp.maximum(jnp.dot(bf(h1), bf(w2)) + b2, 0.0)
    return jnp.dot(bf(h2), bf(w3)) + b3


if __name__ == "__main__":
    # TODO(synk): training-mode dropout (p=0.2) not implemented; forward runs
    # in eval mode (identity), matching inference semantics.
    num_classes = 10
    key = jax.random.PRNGKey(0)
    kx, kx2, kp = jax.random.split(key, 3)

    params = init_params(kp, num_classes)
    packed = pack_params(params)

    # Small canonical check (batch=2, NCHW MNIST-shaped input).
    x = jax.random.normal(kx, (2, 1, 28, 28), dtype=jnp.float32)
    out = mlp_forward(x, packed, num_classes)
    jax.block_until_ready(out)
    ref = ref_forward(x, params)
    assert out.shape == (2, num_classes)
    assert jnp.allclose(out, ref, atol=5e-3, rtol=5e-3)

    # Secondary check exercising the multi-step streamed grid + batch padding.
    xb = jax.random.normal(kx2, (300, 1, 28, 28), dtype=jnp.float32)
    outb = mlp_forward(xb, packed, num_classes)
    jax.block_until_ready(outb)
    refb = ref_forward(xb, params)
    assert outb.shape == (300, num_classes)
    assert jnp.allclose(outb, refb, atol=5e-3, rtol=5e-3)

    print("KERNEL_OK")
</pallas_src>

<mosaic_0001>
module attributes {stable_mosaic.version = 11 : i64} {
  func.func @mlp_kernel(%arg0: i32, %arg1: memref<8x784xbf16, #tpu.memory_space<vmem>>, %arg2: memref<784x512xbf16, #tpu.memory_space<vmem>>, %arg3: memref<1x512xf32, #tpu.memory_space<vmem>>, %arg4: memref<512x384xbf16, #tpu.memory_space<vmem>>, %arg5: memref<1x384xf32, #tpu.memory_space<vmem>>, %arg6: memref<384x128xbf16, #tpu.memory_space<vmem>>, %arg7: memref<1x128xf32, #tpu.memory_space<vmem>>, %arg8: memref<8x128xf32, #tpu.memory_space<vmem>>) attributes {dimension_semantics = [#tpu.dimension_semantics<parallel>], iteration_bounds = array<i64: 1>, scalar_prefetch = 0 : i64, scratch_operands = 0 : i64, tpu.core_type = #tpu.core_type<tc>, window_params = [{transform_indices = @transform_0, window_bounds = array<i64: 8, 784>}, {pipeline_mode = #tpu.pipeline_mode<synchronous>, transform_indices = @transform_1, window_bounds = array<i64: 784, 512>}, {pipeline_mode = #tpu.pipeline_mode<synchronous>, transform_indices = @transform_2, window_bounds = array<i64: 1, 512>}, {pipeline_mode = #tpu.pipeline_mode<synchronous>, transform_indices = @transform_3, window_bounds = array<i64: 512, 384>}, {pipeline_mode = #tpu.pipeline_mode<synchronous>, transform_indices = @transform_4, window_bounds = array<i64: 1, 384>}, {pipeline_mode = #tpu.pipeline_mode<synchronous>, transform_indices = @transform_5, window_bounds = array<i64: 384, 128>}, {pipeline_mode = #tpu.pipeline_mode<synchronous>, transform_indices = @transform_6, window_bounds = array<i64: 1, 128>}, {transform_indices = @transform_7, window_bounds = array<i64: 8, 128>}]} {
    %c0 = arith.constant 0 : index
    %c0_0 = arith.constant 0 : index
    %0 = vector.load %arg1[%c0, %c0_0] : memref<8x784xbf16, #tpu.memory_space<vmem>>, vector<8x784xbf16>
    %c0_1 = arith.constant 0 : index
    %c0_2 = arith.constant 0 : index
    %1 = vector.load %arg2[%c0_1, %c0_2] : memref<784x512xbf16, #tpu.memory_space<vmem>>, vector<784x512xbf16>
    %cst = arith.constant dense<0.000000e+00> : vector<8x512xf32>
    %2 = tpu.matmul %0, %1, %cst {dimension_numbers = #tpu.dot_dimension_numbers<[1], [0], [0], [1], [0, 0, 1, 1], [], []>} : vector<8x784xbf16>, vector<784x512xbf16>, vector<8x512xf32> -> vector<8x512xf32>
    %c0_3 = arith.constant 0 : index
    %c0_4 = arith.constant 0 : index
    %3 = vector.load %arg3[%c0_3, %c0_4] : memref<1x512xf32, #tpu.memory_space<vmem>>, vector<1x512xf32>
    %4 = vector.broadcast %3 : vector<1x512xf32> to vector<8x512xf32>
    %5 = arith.addf %2, %4 : vector<8x512xf32>
    %cst_5 = arith.constant 0.000000e+00 : f32
    %6 = vector.broadcast %cst_5 : f32 to vector<8x512xf32>
    %7 = arith.maximumf %5, %6 : vector<8x512xf32>
    %8 = arith.truncf %7 : vector<8x512xf32> to vector<8x512xbf16>
    %c0_6 = arith.constant 0 : index
    %c0_7 = arith.constant 0 : index
    %9 = vector.load %arg4[%c0_6, %c0_7] : memref<512x384xbf16, #tpu.memory_space<vmem>>, vector<512x384xbf16>
    %cst_8 = arith.constant dense<0.000000e+00> : vector<8x384xf32>
    %10 = tpu.matmul %8, %9, %cst_8 {dimension_numbers = #tpu.dot_dimension_numbers<[1], [0], [0], [1], [0, 0, 1, 1], [], []>} : vector<8x512xbf16>, vector<512x384xbf16>, vector<8x384xf32> -> vector<8x384xf32>
    %c0_9 = arith.constant 0 : index
    %c0_10 = arith.constant 0 : index
    %11 = vector.load %arg5[%c0_9, %c0_10] : memref<1x384xf32, #tpu.memory_space<vmem>>, vector<1x384xf32>
    %12 = vector.broadcast %11 : vector<1x384xf32> to vector<8x384xf32>
    %13 = arith.addf %10, %12 : vector<8x384xf32>
    %cst_11 = arith.constant 0.000000e+00 : f32
    %14 = vector.broadcast %cst_11 : f32 to vector<8x384xf32>
    %15 = arith.maximumf %13, %14 : vector<8x384xf32>
    %16 = arith.truncf %15 : vector<8x384xf32> to vector<8x384xbf16>
    %c0_12 = arith.constant 0 : index
    %c0_13 = arith.constant 0 : index
    %17 = vector.load %arg6[%c0_12, %c0_13] : memref<384x128xbf16, #tpu.memory_space<vmem>>, vector<384x128xbf16>
    %cst_14 = arith.constant dense<0.000000e+00> : vector<8x128xf32>
    %18 = tpu.matmul %16, %17, %cst_14 {dimension_numbers = #tpu.dot_dimension_numbers<[1], [0], [0], [1], [0, 0, 1, 1], [], []>} : vector<8x384xbf16>, vector<384x128xbf16>, vector<8x128xf32> -> vector<8x128xf32>
    %c0_15 = arith.constant 0 : index
    %c0_16 = arith.constant 0 : index
    %19 = vector.load %arg7[%c0_15, %c0_16] : memref<1x128xf32, #tpu.memory_space<vmem>>, vector<1x128xf32>
    %20 = vector.broadcast %19 : vector<1x128xf32> to vector<8x128xf32>
    %21 = arith.addf %18, %20 : vector<8x128xf32>
    %c0_17 = arith.constant 0 : index
    %c0_18 = arith.constant 0 : index
    %22 = vector.load %arg8[%c0_17, %c0_18] : memref<8x128xf32, #tpu.memory_space<vmem>>, vector<8x128xf32>
    tpu.vector_store %arg8[%c0_17, %c0_18], %21 {strides = array<i32>} : memref<8x128xf32, #tpu.memory_space<vmem>>, vector<8x128xf32>,
    return
  }
  func.func @transform_0(%arg0: i32) -> (i32, i32) {
    %c0_i32 = arith.constant 0 : i32
    %c0_i32_0 = arith.constant 0 : i32
    return %arg0, %c0_i32 : i32, i32
  }
  func.func @transform_1(%arg0: i32) -> (i32, i32) {
    %c0_i32 = arith.constant 0 : i32
    %c0_i32_0 = arith.constant 0 : i32
    %c0_i32_1 = arith.constant 0 : i32
    return %c0_i32, %c0_i32_0 : i32, i32
  }
  func.func @transform_2(%arg0: i32) -> (i32, i32) {
    %c0_i32 = arith.constant 0 : i32
    %c0_i32_0 = arith.constant 0 : i32
    %c0_i32_1 = arith.constant 0 : i32
    return %c0_i32, %c0_i32_0 : i32, i32
  }
  func.func @transform_3(%arg0: i32) -> (i32, i32) {
    %c0_i32 = arith.constant 0 : i32
    %c0_i32_0 = arith.constant 0 : i32
    %c0_i32_1 = arith.constant 0 : i32
    return %c0_i32, %c0_i32_0 : i32, i32
  }
  func.func @transform_4(%arg0: i32) -> (i32, i32) {
    %c0_i32 = arith.constant 0 : i32
    %c0_i32_0 = arith.constant 0 : i32
    %c0_i32_1 = arith.constant 0 : i32
    return %c0_i32, %c0_i32_0 : i32, i32
  }
  func.func @transform_5(%arg0: i32) -> (i32, i32) {
    %c0_i32 = arith.constant 0 : i32
    %c0_i32_0 = arith.constant 0 : i32
    %c0_i32_1 = arith.constant 0 : i32
    return %c0_i32, %c0_i32_0 : i32, i32
  }
  func.func @transform_6(%arg0: i32) -> (i32, i32) {
    %c0_i32 = arith.constant 0 : i32
    %c0_i32_0 = arith.constant 0 : i32
    %c0_i32_1 = arith.constant 0 : i32
    return %c0_i32, %c0_i32_0 : i32, i32
  }
  func.func @transform_7(%arg0: i32) -> (i32, i32) {
    %c0_i32 = arith.constant 0 : i32
    %c0_i32_0 = arith.constant 0 : i32
    return %arg0, %c0_i32 : i32, i32
  }
}

</mosaic_0001>

<bundles_post_ra>
// kernel: tpu_custom_call.1
= control target key start
LH: loop header
LB: loop body
LE: loop exit
PB: predicated region body
PF: predicated region fallthrough
CT: control target
= control target key end

     0   :  { %12 = vsyncpa [#allocation3], 0  ;;  %s4671_s0 = inlined_call_operand.hbm [shape: bf16[8,784], index: 0, kind: input, shape index: {}]   ;;  %s4672_s1 = inlined_call_operand.hbm [shape: bf16[784,512], index: 1, kind: input, shape index: {}]   ;;  %s4673_s2 = inlined_call_operand.hbm [shape: f32[1,512], index: 2, kind: input, shape index: {}]   ;;  %s4674_s3 = inlined_call_operand.hbm [shape: bf16[512,384], index: 3, kind: input, shape index: {}]   ;;  %s4675_s4 = inlined_call_operand.vmem [shape: f32[1,384], index: 4, kind: input, shape index: {}]   ;;  %s4676_s5 = inlined_call_operand.hbm [shape: bf16[384,128], index: 5, kind: input, shape index: {}]   ;;  %s4677_s6 = inlined_call_operand.vmem [shape: f32[1,128], index: 6, kind: input, shape index: {}]   ;;  %s4678_s7 = inlined_call_operand.hbm [shape: f32[8,128], index: 7, kind: output, shape index: {}]  }
   0x1   :  { %13 = vsyncpa [#allocation6], 0 }
   0x2   :  { %14 = vsyncpa [#allocation9], 0  ;;  %s31_s26 = sshll.u32 %s4672_s1, 4  ;;  %s32_s26 = int_to_ptr.hbm [resolvable:$true] %s31_s26 }
   0x3   :  { %15 = vsyncpa [#allocation4], 0  ;;  %s4506_s27 = smov [#allocation5]   ;;  %s55_s8 = sshll.u32 %s4674_s3, 4  ;;  %s56_s8 = int_to_ptr.hbm [resolvable:$true] %s55_s8 }
   0x4   :  { %s33_s28 = sshll.u32 %s4506_s27, 4  ;;  %s4507_s9 = smov 256   ;;  %s34_s28 = int_to_ptr.vmem [resolvable:$true] %s33_s28 }
   0x5   :  { %s4508_s10 = smov 16   ;;  %s4509_s11 = smov [#allocation8]  }
   0x6   :  { %39 = dma.hbm_to_vmem [thread:$0]  %s32_s26, 25088, %s34_s28, [#allocation6], %s4507_s9, %s4507_s9, %s4508_s10  }
   0x7   :  { %s57_s12 = sshll.u32 %s4509_s11, 4  ;;  %s4510_s13 = smov 192   ;;  %s58_s12 = int_to_ptr.vmem [resolvable:$true] %s57_s12 }
   0x8   :  { %s4511_s14 = smov 12   ;;  %s21_s16 = sshll.u32 %s4671_s0, 4  ;;  %s22_s16 = int_to_ptr.hbm [resolvable:$true] %s21_s16 }
   0x9   :  { %63 = dma.hbm_to_vmem [thread:$0]  %s56_s8, 12288, %s58_s12, [#allocation9], %s4510_s13, %s4510_s13, %s4511_s14  }
   0xa   :  { %s4512_s17 = smov [#allocation2]   ;;  %s45_s20 = sshll.u32 %s4673_s2, 4  ;;  %s46_s20 = int_to_ptr.hbm [resolvable:$true] %s45_s20 }
   0xb   :  { %s23_s18 = sshll.u32 %s4512_s17, 4  ;;  %s4513_s21 = smov [#allocation7]   ;;  %s24_s18 = int_to_ptr.vmem [resolvable:$true] %s23_s18 }
   0xc   :  { %26 = dma.hbm_to_vmem [thread:$0]  %s22_s16, 448, %s24_s18, [#allocation3]  }
   0xd   :  { %s47_s22 = sshll.u32 %s4513_s21, 4  ;;  %s70_s25 = sshll.u32 %s4676_s5, 4  ;;  %s48_s22 = int_to_ptr.vmem [resolvable:$true] %s47_s22  ;;  %s71_s25 = int_to_ptr.hbm [resolvable:$true] %s70_s25 }
   0xe   :  { %50 = dma.hbm_to_vmem [thread:$0]  %s46_s20, 64, %s48_s22, [#allocation6]  }
   0xf   :  { %s4514_s0 = smov [#allocation10]   ;;  %s4515_s27 = smov 64  }
  0x10   :  { %s72_s26 = sshll.u32 %s4514_s0, 4  ;;  %s4516_s28 = smov 4   ;;  %s73_s26 = int_to_ptr.vmem [resolvable:$true] %s72_s26 }
  0x11   :  { %78 = dma.hbm_to_vmem [thread:$0]  %s71_s25, 3072, %s73_s26, [#allocation9], %s4515_s27, %s4515_s27, %s4516_s28  }
  0x12   :  { %4498 = dma.done.wait [#allocation3], 448  }
  0x13   :  { %4499 = vsyncadd [#allocation3], 4294966848 }
  0x14   :  { %4500 = dma.done.wait [#allocation6], 25152  }
  0x15   :  { %4501 = vsyncadd [#allocation6], 4294942144 }
  0x16   :  { %4502 = dma.done.wait [#allocation9], 15360  }
  0x17   :  { %4503 = vsyncadd [#allocation9], 4294951936  ;;  %v2871_v0 = vld [vmem:[#allocation5 + $0xe0] sm:$0xf]  ;;  %v4055_v1 = vld [vmem:[#allocation5 + $0xec] sm:$0xf0] }
  0x18   :  { %v2999_v2 = vld [vmem:[#allocation5 + $0x1e0] sm:$0xf]  ;;  %v2872_v3 = vor.u32 %v4055_v1, %v2871_v0  ;;  %v4087_v4 = vld [vmem:[#allocation5 + $0x1ec] sm:$0xf0]  ;;  %vm1316_vm0 = vcmask 130048   ;;  %s4517_s30 = smov [#allocation11]  }
  0x19   :  { %v3127_v5 = vld [vmem:[#allocation5 + $0x2e0] sm:$0xf]  ;;  %v4119_v6 = vld [vmem:[#allocation5 + $0x2ec] sm:$0xf0]  ;;  %v3000_v7 = vor.u32 %v4087_v4, %v2999_v2  ;;  %s2743_s8 = sshll.u32 %s4517_s30, 4  ;;  %s2745_s11 = sshll.u32 %s4678_s7, 4  ;;  %s2744_s8 = int_to_ptr.vmem [resolvable:$true] %s2743_s8  ;;  %s2746_s11 = int_to_ptr.hbm [resolvable:$true] %s2745_s11 }
  0x1a   :  { %v3128_v8 = vor.u32 %v4119_v6, %v3127_v5  ;;  %v3255_v9 = vld [vmem:[#allocation5 + $0x3e0] sm:$0xf]  ;;  %v4151_v10 = vld [vmem:[#allocation5 + $0x3ec] sm:$0xf0]  ;;  %1320 = vmatpush.bf16.msra.mxu0 %v2872_v3 }
  0x1b   :  { %v2855_v11 = vld [vmem:[#allocation5 + $0xc0] sm:$0xf]  ;;  %v3256_v12 = vor.u32 %v4151_v10, %v3255_v9  ;;  %v4051_v13 = vld [vmem:[#allocation5 + $0xcc] sm:$0xf0]  ;;  %1333 = vmatpush.bf16.msra.mxu1 %v3000_v7 }
  0x1c   :  { %v2983_v14 = vld [vmem:[#allocation5 + $0x1c0] sm:$0xf]  ;;  %v4083_v15 = vld [vmem:[#allocation5 + $0x1cc] sm:$0xf0]  ;;  %1346 = vmatpush.bf16.msra.mxu2 %v3128_v8  ;;  %v2856_v16 = vor.u32 %v4051_v13, %v2855_v11 }
  0x1d   :  { %v2984_v17 = vor.u32 %v4083_v15, %v2983_v14  ;;  %v3111_v18 = vld [vmem:[#allocation5 + $0x2c0] sm:$0xf]  ;;  %v4115_v19 = vld [vmem:[#allocation5 + $0x2cc] sm:$0xf0]  ;;  %1359 = vmatpush.bf16.msra.mxu3 %v3256_v12 }
  0x1e   :  { %v3239_v20 = vld [vmem:[#allocation5 + $0x3c0] sm:$0xf]  ;;  %v3112_v21 = vor.u32 %v4115_v19, %v3111_v18  ;;  %v4147_v22 = vld [vmem:[#allocation5 + $0x3cc] sm:$0xf0]  ;;  %1321 = vmatpush.bf16.msra.mxu0 %v2856_v16 }
  0x1f   :  { %v2839_v23 = vld [vmem:[#allocation5 + $0xa0] sm:$0xf]  ;;  %v4047_v24 = vld [vmem:[#allocation5 + $0xac] sm:$0xf0]  ;;  %v3240_v25 = vor.u32 %v4147_v22, %v3239_v20  ;;  %1334 = vmatpush.bf16.msra.mxu1 %v2984_v17 }
  0x20   :  { %v2967_v26 = vld [vmem:[#allocation5 + $0x1a0] sm:$0xf]  ;;  %v4079_v27 = vld [vmem:[#allocation5 + $0x1ac] sm:$0xf0]  ;;  %v2840_v29 = vor.u32 %v4047_v24, %v2839_v23  ;;  %1347 = vmatpush.bf16.msra.mxu2 %v3112_v21 }
  0x21   :  { %v3095_v28 = vld [vmem:[#allocation5 + $0x2a0] sm:$0xf]  ;;  %v4111_v30 = vld [vmem:[#allocation5 + $0x2ac] sm:$0xf0]  ;;  %v2968_v33 = vor.u32 %v4079_v27, %v2967_v26  ;;  %1360 = vmatpush.bf16.msra.mxu3 %v3240_v25 }
  0x22   :  { %v3223_v31 = vld [vmem:[#allocation5 + $0x3a0] sm:$0xf]  ;;  %v4143_v32 = vld [vmem:[#allocation5 + $0x3ac] sm:$0xf0]  ;;  %v3096_v34 = vor.u32 %v4111_v30, %v3095_v28  ;;  %1322 = vmatpush.bf16.msra.mxu0 %v2840_v29 }
  0x23   :  { %v2823_v35 = vld [vmem:[#allocation5 + $0x80] sm:$0xf]  ;;  %v4043_v36 = vld [vmem:[#allocation5 + $0x8c] sm:$0xf0]  ;;  %v3224_v38 = vor.u32 %v4143_v32, %v3223_v31  ;;  %1335 = vmatpush.bf16.msra.mxu1 %v2968_v33 }
  0x24   :  { %v2951_v37 = vld [vmem:[#allocation5 + $0x180] sm:$0xf]  ;;  %v4075_v39 = vld [vmem:[#allocation5 + $0x18c] sm:$0xf0]  ;;  %v2824_v44 = vor.u32 %v4043_v36, %v2823_v35  ;;  %1348 = vmatpush.bf16.msra.mxu2 %v3096_v34  ;;  %v4053_v34 = vld [vmem:[#allocation5 + $0xe4] sm:$0xf] }
  0x25   :  { %v3079_v40 = vld [vmem:[#allocation5 + $0x280] sm:$0xf]  ;;  %v4107_v41 = vld [vmem:[#allocation5 + $0x28c] sm:$0xf0]  ;;  %v2952_v45 = vor.u32 %v4075_v39, %v2951_v37  ;;  %1361 = vmatpush.bf16.msra.mxu3 %v3224_v38  ;;  %v2873_v35 = vld [vmem:[#allocation5 + $0xf0] sm:$0xf0] }
  0x26   :  { %v3207_v42 = vld [vmem:[#allocation5 + $0x380] sm:$0xf]  ;;  %v4139_v43 = vld [vmem:[#allocation5 + $0x38c] sm:$0xf0]  ;;  %v3080_v46 = vor.u32 %v4107_v41, %v3079_v40  ;;  %1323 = vmatpush.bf16.msra.mxu0 %v2824_v44  ;;  %v102_v37 = vld [vmem:[#allocation2] sm:$0xff] }
  0x27   :  { %v2807_v47 = vld [vmem:[#allocation5 + $0x60] sm:$0xf]  ;;  %v4039_v48 = vld [vmem:[#allocation5 + $0x6c] sm:$0xf0]  ;;  %v3208_v50 = vor.u32 %v4139_v43, %v3207_v42  ;;  %1336 = vmatpush.bf16.msra.mxu1 %v2952_v45  ;;  %v316_v41 = vunpack.c.l.b16 %v102_v37 }
  0x28   :  { %v2935_v49 = vld [vmem:[#allocation5 + $0x160] sm:$0xf]  ;;  %v4071_v51 = vld [vmem:[#allocation5 + $0x16c] sm:$0xf0]  ;;  %v2808_v56 = vor.u32 %v4039_v48, %v2807_v47  ;;  %1349 = vmatpush.bf16.msra.mxu2 %v3080_v46  ;;  %v4085_v46 = vld [vmem:[#allocation5 + $0x1e4] sm:$0xf] }
  0x29   :  { %v3063_v52 = vld [vmem:[#allocation5 + $0x260] sm:$0xf]  ;;  %v4103_v53 = vld [vmem:[#allocation5 + $0x26c] sm:$0xf0]  ;;  %v2936_v57 = vor.u32 %v4071_v51, %v2935_v49  ;;  %1362 = vmatpush.bf16.msra.mxu3 %v3208_v50  ;;  %v3001_v47 = vld [vmem:[#allocation5 + $0x1f0] sm:$0xf0]  ;;  %v2876_v49 = vor.u32 %v4053_v34, %v2873_v35 }
  0x2a   :  { %v3191_v54 = vld [vmem:[#allocation5 + $0x360] sm:$0xf]  ;;  %v4135_v55 = vld [vmem:[#allocation5 + $0x36c] sm:$0xf0]  ;;  %v3064_v58 = vor.u32 %v4103_v53, %v3063_v52  ;;  %1324 = vmatpush.bf16.msra.mxu0 %v2808_v56  ;;  %v2857_v56 = vld [vmem:[#allocation5 + $0xd0] sm:$0xf0] }
  0x2b   :  { %v2791_v59 = vld [vmem:[#allocation5 + $0x40] sm:$0xf]  ;;  %v4035_v60 = vld [vmem:[#allocation5 + $0x4c] sm:$0xf0]  ;;  %v3192_v62 = vor.u32 %v4135_v55, %v3191_v54  ;;  %1337 = vmatpush.bf16.msra.mxu1 %v2936_v57  ;;  %v4049_v55 = vld [vmem:[#allocation5 + $0xc4] sm:$0xf]  ;;  %v4575_v57 = vpack.c.b16 %v316_v41, %v316_v41 }
  0x2c   :  { %v2919_v61 = vld [vmem:[#allocation5 + $0x140] sm:$0xf]  ;;  %v4067_v63 = vld [vmem:[#allocation5 + $0x14c] sm:$0xf0]  ;;  %v2792_v4 = vor.u32 %v4035_v60, %v2791_v59  ;;  %1350 = vmatpush.bf16.msra.mxu2 %v3064_v58  ;;  %v317_v58 = vunpack.c.h.b16 %v102_v37  ;;  %v2809_v34 = vld [vmem:[#allocation5 + $0x70] sm:$0xf0] }
  0x2d   :  { %v3047_v0 = vld [vmem:[#allocation5 + $0x240] sm:$0xf]  ;;  %v4099_v1 = vld [vmem:[#allocation5 + $0x24c] sm:$0xf0]  ;;  %v2920_v5 = vor.u32 %v4067_v63, %v2919_v61  ;;  %1363 = vmatpush.bf16.msra.mxu3 %v3192_v62  ;;  %v3004_v61 = vor.u32 %v4085_v46, %v3001_v47  ;;  %v4081_v63 = vld [vmem:[#allocation5 + $0x1c4] sm:$0xf] }
  0x2e   :  { %v3175_v2 = vld [vmem:[#allocation5 + $0x340] sm:$0xf]  ;;  %v4131_v3 = vld [vmem:[#allocation5 + $0x34c] sm:$0xf0]  ;;  %v3048_v6 = vor.u32 %v4099_v1, %v3047_v0  ;;  %1325 = vmatpush.bf16.msra.mxu0 %v2792_v4  ;;  %v2985_v0 = vld [vmem:[#allocation5 + $0x1d0] sm:$0xf0] }
  0x2f   :  { %v2775_v7 = vld [vmem:[#allocation5 + $0x20] sm:$0xf]  ;;  %v4031_v8 = vld [vmem:[#allocation5 + $0x2c] sm:$0xf0]  ;;  %v3176_v10 = vor.u32 %v4131_v3, %v3175_v2  ;;  %1338 = vmatpush.bf16.msra.mxu1 %v2920_v5  ;;  %v2860_v2 = vor.u32 %v4049_v55, %v2857_v56  ;;  %v4033_v46 = vld [vmem:[#allocation5 + $0x44] sm:$0xf] }
  0x30   :  { %v2903_v9 = vld [vmem:[#allocation5 + $0x120] sm:$0xf]  ;;  %v4063_v11 = vld [vmem:[#allocation5 + $0x12c] sm:$0xf0]  ;;  %v2776_v17 = vor.u32 %v4031_v8, %v2775_v7  ;;  %1351 = vmatpush.bf16.msra.mxu2 %v3048_v6  ;;  %v4045_v7 = vld [vmem:[#allocation5 + $0xa4] sm:$0xf] }
  0x31   :  { %v3031_v12 = vld [vmem:[#allocation5 + $0x220] sm:$0xf]  ;;  %v4095_v13 = vld [vmem:[#allocation5 + $0x22c] sm:$0xf0]  ;;  %v2904_v21 = vor.u32 %v4063_v11, %v2903_v9  ;;  %1364 = vmatpush.bf16.msra.mxu3 %v3176_v10  ;;  %v2841_v8 = vld [vmem:[#allocation5 + $0xb0] sm:$0xf0]  ;;  %v4581_v9 = vpack.c.b16 %v317_v58, %v317_v58  ;;  %v2988_v10 = vor.u32 %v4081_v63, %v2985_v0 }
  0x32   :  { %v3159_v14 = vld [vmem:[#allocation5 + $0x320] sm:$0xf]  ;;  %v4127_v15 = vld [vmem:[#allocation5 + $0x32c] sm:$0xf0]  ;;  %v3032_v22 = vor.u32 %v4095_v13, %v3031_v12  ;;  %1326 = vmatpush.bf16.msra.mxu0 %v2776_v17  ;;  %v4077_v12 = vld [vmem:[#allocation5 + $0x1a4] sm:$0xf] }
  0x33   :  { %v2759_v16 = vld [vmem:[#allocation5] sm:$0xf]  ;;  %v4027_v18 = vld [vmem:[#allocation5 + $0xc] sm:$0xf0]  ;;  %v3160_v26 = vor.u32 %v4127_v15, %v3159_v14  ;;  %1339 = vmatpush.bf16.msra.mxu1 %v2904_v21  ;;  %v2969_v13 = vld [vmem:[#allocation5 + $0x1b0] sm:$0xf0]  ;;  %v2844_v15 = vor.u32 %v4045_v7, %v2841_v8 }
  0x34   :  { %v2887_v19 = vld [vmem:[#allocation5 + $0x100] sm:$0xf]  ;;  %v4059_v20 = vld [vmem:[#allocation5 + $0x10c] sm:$0xf0]  ;;  %v2760_v33 = vor.u32 %v4027_v18, %v2759_v16  ;;  %1352 = vmatpush.bf16.msra.mxu2 %v3032_v22  ;;  %v2825_v21 = vld [vmem:[#allocation5 + $0x90] sm:$0xf0] }
  0x35   :  { %v3015_v23 = vld [vmem:[#allocation5 + $0x200] sm:$0xf]  ;;  %v4091_v24 = vld [vmem:[#allocation5 + $0x20c] sm:$0xf0]  ;;  %v2888_v38 = vor.u32 %v4059_v20, %v2887_v19  ;;  %1365 = vmatpush.bf16.msra.mxu3 %v3160_v26  ;;  %v4041_v20 = vld [vmem:[#allocation5 + $0x84] sm:$0xf] }
  0x36   :  { %v103_v25 = vld [vmem:[#allocation2 + $0x8] sm:$0xff]  ;;  %v3143_v27 = vld [vmem:[#allocation5 + $0x300] sm:$0xf]  ;;  %v3016_v39 = vor.u32 %v4091_v24, %v3015_v23  ;;  %1327 = vmatpush.bf16.msra.mxu0 %v2760_v33  ;;  %v105_v22 = vld [vmem:[#allocation2 + $0x18] sm:$0xf]  ;;  %v2972_v23 = vor.u32 %v4077_v12, %v2969_v13 }
  0x37   :  { %v4123_v28 = vld [vmem:[#allocation5 + $0x30c] sm:$0xf0]  ;;  %v3383_v29 = vld [vmem:[#allocation5 + $0x4e0] sm:$0xf]  ;;  %v318_v36 = vunpack.c.l.b16 %v103_v25  ;;  %v319_v42 = vunpack.c.h.b16 %v103_v25  ;;  %1340 = vmatpush.bf16.msra.mxu1 %v2888_v38  ;;  %v4073_v25 = vld [vmem:[#allocation5 + $0x184] sm:$0xf]  ;;  %v322_v35 = vunpack.c.l.b16 %v105_v22 }
  0x38   :  { %v4183_v30 = vld [vmem:[#allocation5 + $0x4ec] sm:$0xf0]  ;;  %v3511_v31 = vld [vmem:[#allocation5 + $0x5e0] sm:$0xf]  ;;  %v3144_v43 = vor.u32 %v4123_v28, %v3143_v27  ;;  %1353 = vmatpush.bf16.msra.mxu2 %v3016_v39  ;;  %v2953_v26 = vld [vmem:[#allocation5 + $0x190] sm:$0xf0]  ;;  %v2828_v28 = vor.u32 %v4041_v20, %v2825_v21 }
  0x39   :  { %v4215_v32 = vld [vmem:[#allocation5 + $0x5ec] sm:$0xf0]  ;;  %v3527_v40 = vld [vmem:[#allocation5 + $0x600] sm:$0xf]  ;;  %v3384_v44 = vor.u32 %v4183_v30, %v3383_v29  ;;  %v4573_v53 = vpack.c.b16 %v318_v36, %v318_v36  ;;  %v4577_v60 = vpack.c.b16 %v319_v42, %v319_v42  ;;  %1328 = vmatmul.bf16.vlgmr.msra.gmra.mxu0 %v4575_v57  ;;  %v4037_v33 = vld [vmem:[#allocation5 + $0x64] sm:$0xf]  ;;  %v2956_v36 = vor.u32 %v4073_v25, %v2953_v26 }
  0x3a   :  { %v4219_v45 = vld [vmem:[#allocation5 + $0x60c] sm:$0xf0]  ;;  %v3512_v48 = vor.u32 %v4215_v32, %v3511_v31  ;;  %v3367_v50 = vld [vmem:[#allocation5 + $0x4c0] sm:$0xf]  ;;  %1366 = vmatpush.bf16.msra.mxu3 %v3144_v43  ;;  %1341 = vmatmul.bf16.vlgmr.msra.gmra.mxu1 %v4581_v9  ;;  %v4069_v38 = vld [vmem:[#allocation5 + $0x164] sm:$0xf]  ;;  %v2812_v41 = vor.u32 %v4037_v33, %v2809_v34 }
  0x3b   :  { %v4179_v51 = vld [vmem:[#allocation5 + $0x4cc] sm:$0xf0]  ;;  %v3495_v52 = vld [vmem:[#allocation5 + $0x5c0] sm:$0xf]  ;;  %v3528_v59 = vor.u32 %v4219_v45, %v3527_v40  ;;  %1372 = vmatpush.bf16.msrb.mxu0 %v3384_v44  ;;  %1354 = vmatmul.bf16.vlgmr.msra.gmra.mxu2 %v4573_v53  ;;  %v2937_v39 = vld [vmem:[#allocation5 + $0x170] sm:$0xf0] }
  0x3c   :  { %v4211_v54 = vld [vmem:[#allocation5 + $0x5cc] sm:$0xf0]  ;;  %v3368_v62 = vor.u32 %v4179_v51, %v3367_v50  ;;  %1385 = vmatpush.bf16.msrb.mxu1 %v3512_v48  ;;  %v3351_v3 = vld [vmem:[#allocation5 + $0x4a0] sm:$0xf]  ;;  %v2793_v47 = vld [vmem:[#allocation5 + $0x50] sm:$0xf0]  ;;  %v4585_v48 = vpack.c.b16 %v322_v35, %v322_v35 }
  0x3d   :  { %v3496_v1 = vor.u32 %v4211_v54, %v3495_v52  ;;  %v4175_v4 = vld [vmem:[#allocation5 + $0x4ac] sm:$0xf0]  ;;  %v3479_v5 = vld [vmem:[#allocation5 + $0x5a0] sm:$0xf]  ;;  %1405 = vmatpush.bf16.msrb.mxu2 %v3528_v59  ;;  %1367 = vmatmul.bf16.vlgmr.msra.gmra.mxu3 %v4577_v60  ;;  %v4065_v51 = vld [vmem:[#allocation5 + $0x144] sm:$0xf]  ;;  %v2796_v55 = vor.u32 %v4033_v46, %v2793_v47 }
  0x3e   :  { %1411 = vmatpush.bf16.msrb.mxu3 %v2876_v49  ;;  %v4207_v6 = vld [vmem:[#allocation5 + $0x5ac] sm:$0xf0]  ;;  %v3352_v11 = vor.u32 %v4175_v4, %v3351_v3  ;;  %v3335_v16 = vld [vmem:[#allocation5 + $0x480] sm:$0xf]  ;;  %v2940_v49 = vor.u32 %v4069_v38, %v2937_v39  ;;  %v2921_v52 = vld [vmem:[#allocation5 + $0x150] sm:$0xf0] }
  0x3f   :  { %1373 = vmatpush.bf16.msrb.mxu0 %v3368_v62  ;;  %v3480_v14 = vor.u32 %v4207_v6, %v3479_v5  ;;  %v4171_v17 = vld [vmem:[#allocation5 + $0x48c] sm:$0xf0]  ;;  %v3463_v18 = vld [vmem:[#allocation5 + $0x580] sm:$0xf]  ;;  %v4029_v62 = vld [vmem:[#allocation5 + $0x24] sm:$0xf] }
  0x40   :  { %1386 = vmatpush.bf16.msrb.mxu1 %v3496_v1  ;;  %v4203_v19 = vld [vmem:[#allocation5 + $0x58c] sm:$0xf0]  ;;  %v3336_v24 = vor.u32 %v4171_v17, %v3335_v16  ;;  %v3319_v29 = vld [vmem:[#allocation5 + $0x460] sm:$0xf]  ;;  %v2777_v63 = vld [vmem:[#allocation5 + $0x30] sm:$0xf0]  ;;  %v2924_v1 = vor.u32 %v4065_v51, %v2921_v52 }
  0x41   :  { %1424 = vmatpush.bf16.msra.mxu2 %v3004_v61  ;;  %v3464_v27 = vor.u32 %v4203_v19, %v3463_v18  ;;  %v4167_v30 = vld [vmem:[#allocation5 + $0x46c] sm:$0xf0]  ;;  %v3447_v31 = vld [vmem:[#allocation5 + $0x560] sm:$0xf]  ;;  %v4061_v0 = vld [vmem:[#allocation5 + $0x124] sm:$0xf]  ;;  %v2780_v7 = vor.u32 %v4029_v62, %v2777_v63 }
  0x42   :  { %1412 = vmatpush.bf16.msrb.mxu3 %v2860_v2  ;;  %v4199_v32 = vld [vmem:[#allocation5 + $0x56c] sm:$0xf0]  ;;  %v3320_v37 = vor.u32 %v4167_v30, %v3319_v29  ;;  %v3303_v42 = vld [vmem:[#allocation5 + $0x440] sm:$0xf]  ;;  %v2905_v3 = vld [vmem:[#allocation5 + $0x130] sm:$0xf0] }
  0x43   :  { %1374 = vmatpush.bf16.msrb.mxu0 %v3352_v11  ;;  %v3448_v40 = vor.u32 %v4199_v32, %v3447_v31  ;;  %v4163_v43 = vld [vmem:[#allocation5 + $0x44c] sm:$0xf0]  ;;  %v3431_v44 = vld [vmem:[#allocation5 + $0x540] sm:$0xf]  ;;  %v104_v5 = vld [vmem:[#allocation2 + $0x10] sm:$0xff]  ;;  %v2908_v19 = vor.u32 %v4061_v0, %v2905_v3 }
  0x44   :  { %1387 = vmatpush.bf16.msrb.mxu1 %v3480_v14  ;;  %v4195_v45 = vld [vmem:[#allocation5 + $0x54c] sm:$0xf0]  ;;  %v3304_v50 = vor.u32 %v4163_v43, %v3303_v42  ;;  %v3287_v56 = vld [vmem:[#allocation5 + $0x420] sm:$0xf]  ;;  %v4025_v12 = vld [vmem:[#allocation5 + $0x4] sm:$0xf]  ;;  %v320_v18 = vunpack.c.l.b16 %v104_v5 }
  0x45   :  { %1425 = vmatpush.bf16.msra.mxu2 %v2988_v10  ;;  %v3432_v54 = vor.u32 %v4195_v45, %v3431_v44  ;;  %v4159_v58 = vld [vmem:[#allocation5 + $0x42c] sm:$0xf0]  ;;  %v3415_v59 = vld [vmem:[#allocation5 + $0x520] sm:$0xf]  ;;  %v2761_v13 = vld [vmem:[#allocation5 + $0x10] sm:$0xf0] }
  0x46   :  { %1413 = vmatpush.bf16.msrb.mxu3 %v2844_v15  ;;  %v4191_v61 = vld [vmem:[#allocation5 + $0x52c] sm:$0xf0]  ;;  %v3288_v2 = vor.u32 %v4159_v58, %v3287_v56  ;;  %v3271_v4 = vld [vmem:[#allocation5 + $0x400] sm:$0xf]  ;;  %v4117_v14 = vld [vmem:[#allocation5 + $0x2e4] sm:$0xf]  ;;  %v2764_v25 = vor.u32 %v4025_v12, %v2761_v13  ;;  %v4589_v34 = vpack.c.b16 %v320_v18, %v320_v18 }
  0x47   :  { %1375 = vmatpush.bf16.msrb.mxu0 %v3336_v24  ;;  %v3416_v6 = vor.u32 %v4191_v61, %v3415_v59  ;;  %v4155_v8 = vld [vmem:[#allocation5 + $0x40c] sm:$0xf0]  ;;  %v3399_v10 = vld [vmem:[#allocation5 + $0x500] sm:$0xf]  ;;  %v3129_v15 = vld [vmem:[#allocation5 + $0x2f0] sm:$0xf0] }
  0x48   :  { %1388 = vmatpush.bf16.msrb.mxu1 %v3464_v27  ;;  %v4187_v11 = vld [vmem:[#allocation5 + $0x50c] sm:$0xf0]  ;;  %v4149_v16 = vld [vmem:[#allocation5 + $0x3e4] sm:$0xf]  ;;  %v3257_v17 = vld [vmem:[#allocation5 + $0x3f0] sm:$0xf0]  ;;  %v3272_v20 = vor.u32 %v4155_v8, %v3271_v4 }
  0x49   :  { %1426 = vmatpush.bf16.msra.mxu2 %v2972_v23  ;;  %v4181_v21 = vld [vmem:[#allocation5 + $0x4e4] sm:$0xf]  ;;  %v3385_v22 = vld [vmem:[#allocation5 + $0x4f0] sm:$0xf0]  ;;  %v321_v23 = vunpack.c.h.b16 %v104_v5  ;;  %v3400_v24 = vor.u32 %v4187_v11, %v3399_v10  ;;  %v3260_v29 = vor.u32 %v4149_v16, %v3257_v17 }
  0x4a   :  { %1414 = vmatpush.bf16.msrb.mxu3 %v2828_v28  ;;  %v4057_v26 = vld [vmem:[#allocation5 + $0x104] sm:$0xf]  ;;  %v2889_v27 = vld [vmem:[#allocation5 + $0x110] sm:$0xf0]  ;;  %v3132_v28 = vor.u32 %v4117_v14, %v3129_v15  ;;  %v3388_v33 = vor.u32 %v4181_v21, %v3385_v22 }
  0x4b   :  { %1376 = vmatpush.bf16.msrb.mxu0 %v3320_v37  ;;  %3541 = vmatmul.msk.bf16.vlgmr.msrb.gmra.mxu2 %vm1316_vm0, %v4585_v48  ;;  %v4213_v30 = vld [vmem:[#allocation5 + $0x5e4] sm:$0xf]  ;;  %v3513_v31 = vld [vmem:[#allocation5 + $0x5f0] sm:$0xf0]  ;;  %v2892_v38 = vor.u32 %v4057_v26, %v2889_v27  ;;  %v4591_v39 = vpack.c.b16 %v321_v23, %v321_v23 }
  0x4c   :  { %1389 = vmatpush.bf16.msrb.mxu1 %v3448_v40  ;;  %v4113_v32 = vld [vmem:[#allocation5 + $0x2c4] sm:$0xf]  ;;  %v3113_v35 = vld [vmem:[#allocation5 + $0x2d0] sm:$0xf0]  ;;  %v3516_v42 = vor.u32 %v4213_v30, %v3513_v31 }
  0x4d   :  { %1427 = vmatpush.bf16.msra.mxu2 %v2956_v36  ;;  %v4145_v36 = vld [vmem:[#allocation5 + $0x3c4] sm:$0xf]  ;;  %v3241_v37 = vld [vmem:[#allocation5 + $0x3d0] sm:$0xf0]  ;;  %v3116_v43 = vor.u32 %v4113_v32, %v3113_v35 }
  0x4e   :  { %1415 = vmatpush.bf16.msrb.mxu3 %v2812_v41  ;;  %v4177_v40 = vld [vmem:[#allocation5 + $0x4c4] sm:$0xf]  ;;  %v3369_v41 = vld [vmem:[#allocation5 + $0x4d0] sm:$0xf0]  ;;  %v3244_v44 = vor.u32 %v4145_v36, %v3241_v37 }
  0x4f   :  { %1377 = vmatpush.bf16.msrb.mxu0 %v3304_v50  ;;  %v4209_v45 = vld [vmem:[#allocation5 + $0x5c4] sm:$0xf]  ;;  %v3497_v46 = vld [vmem:[#allocation5 + $0x5d0] sm:$0xf0] }
  0x50   :  { %1390 = vmatpush.bf16.msrb.mxu1 %v3432_v54  ;;  %v4109_v47 = vld [vmem:[#allocation5 + $0x2a4] sm:$0xf]  ;;  %v3097_v50 = vld [vmem:[#allocation5 + $0x2b0] sm:$0xf0]  ;;  %v3500_v56 = vor.u32 %v4209_v45, %v3497_v46 }
  0x51   :  { %1428 = vmatpush.bf16.msra.mxu2 %v2940_v49  ;;  %v3372_v49 = vor.u32 %v4177_v40, %v3369_v41  ;;  %v4141_v51 = vld [vmem:[#allocation5 + $0x3a4] sm:$0xf]  ;;  %v3225_v52 = vld [vmem:[#allocation5 + $0x3b0] sm:$0xf0]  ;;  %v3100_v58 = vor.u32 %v4109_v47, %v3097_v50 }
  0x52   :  { %1416 = vmatpush.bf16.msrb.mxu3 %v2796_v55  ;;  %v4173_v54 = vld [vmem:[#allocation5 + $0x4a4] sm:$0xf]  ;;  %v3353_v55 = vld [vmem:[#allocation5 + $0x4b0] sm:$0xf0]  ;;  %v3228_v59 = vor.u32 %v4141_v51, %v3225_v52 }
  0x53   :  { %1378 = vmatpush.bf16.msrb.mxu0 %v3288_v2  ;;  %v4205_v61 = vld [vmem:[#allocation5 + $0x5a4] sm:$0xf]  ;;  %v3481_v62 = vld [vmem:[#allocation5 + $0x5b0] sm:$0xf0]  ;;  %v3356_v0 = vor.u32 %v4173_v54, %v3353_v55 }
  0x54   :  { %1391 = vmatpush.bf16.msrb.mxu1 %v3416_v6  ;;  %v4105_v63 = vld [vmem:[#allocation5 + $0x284] sm:$0xf]  ;;  %v3209_v3 = vld [vmem:[#allocation5 + $0x390] sm:$0xf0]  ;;  %v3484_v6 = vor.u32 %v4205_v61, %v3481_v62  ;;  %v2879_v61 = vld [vmem:[#allocation5 + $0xe8] sm:$0xf] }
  0x55   :  { %1429 = vmatpush.bf16.msra.mxu2 %v2924_v1  ;;  %v3081_v1 = vld [vmem:[#allocation5 + $0x290] sm:$0xf0]  ;;  %v4137_v2 = vld [vmem:[#allocation5 + $0x384] sm:$0xf]  ;;  %v4056_v62 = vld [vmem:[#allocation5 + $0xf4] sm:$0xf0] }
  0x56   :  { %1417 = vmatpush.bf16.msrb.mxu3 %v2780_v7  ;;  %v4169_v4 = vld [vmem:[#allocation5 + $0x484] sm:$0xf]  ;;  %v3337_v5 = vld [vmem:[#allocation5 + $0x490] sm:$0xf0]  ;;  %v3084_v7 = vor.u32 %v4105_v63, %v3081_v1  ;;  %v3212_v8 = vor.u32 %v4137_v2, %v3209_v3  ;;  %v3007_v63 = vld [vmem:[#allocation5 + $0x1e8] sm:$0xf] }
  0x57   :  { %1379 = vmatpush.bf16.msrb.mxu0 %v3272_v20  ;;  %v4201_v10 = vld [vmem:[#allocation5 + $0x584] sm:$0xf]  ;;  %v3465_v11 = vld [vmem:[#allocation5 + $0x590] sm:$0xf0]  ;;  %v3340_v13 = vor.u32 %v4169_v4, %v3337_v5  ;;  %v4088_v1 = vld [vmem:[#allocation5 + $0x1f4] sm:$0xf0] }
  0x58   :  { %1392 = vmatpush.bf16.msrb.mxu1 %v3400_v24  ;;  %v4101_v12 = vld [vmem:[#allocation5 + $0x264] sm:$0xf]  ;;  %v3065_v14 = vld [vmem:[#allocation5 + $0x270] sm:$0xf0] }
  0x59   :  { %1430 = vmatpush.bf16.msra.mxu2 %v2908_v19  ;;  %v4133_v15 = vld [vmem:[#allocation5 + $0x364] sm:$0xf]  ;;  %v3193_v16 = vld [vmem:[#allocation5 + $0x370] sm:$0xf0]  ;;  %v3468_v19 = vor.u32 %v4201_v10, %v3465_v11  ;;  %v3068_v20 = vor.u32 %v4101_v12, %v3065_v14  ;;  %v2880_v11 = vor.u32 %v4056_v62, %v2879_v61  ;;  %v4120_v12 = vld [vmem:[#allocation5 + $0x2f4] sm:$0xf0] }
  0x5a   :  { %1418 = vmatpush.bf16.msrb.mxu3 %v2764_v25  ;;  %1380 = vmatmul.bf16.vlgmr.msrb.gmra.mxu0 %v4589_v34  ;;  %v4165_v17 = vld [vmem:[#allocation5 + $0x464] sm:$0xf]  ;;  %v3321_v18 = vld [vmem:[#allocation5 + $0x470] sm:$0xf0]  ;;  %v3196_v21 = vor.u32 %v4133_v15, %v3193_v16  ;;  %v4152_v14 = vld [vmem:[#allocation5 + $0x3f4] sm:$0xf0]  ;;  %v3008_v15 = vor.u32 %v4088_v1, %v3007_v63 }
  0x5b   :  { %1437 = vmatpush.bf16.msra.mxu0 %v3132_v28  ;;  %1393 = vmatmul.bf16.vlgmr.msrb.gmra.mxu1 %v4591_v39  ;;  %v4197_v22 = vld [vmem:[#allocation5 + $0x564] sm:$0xf]  ;;  %v3449_v23 = vld [vmem:[#allocation5 + $0x570] sm:$0xf0]  ;;  %v3324_v25 = vor.u32 %v4165_v17, %v3321_v18  ;;  %v2863_v17 = vld [vmem:[#allocation5 + $0xc8] sm:$0xf] }
  0x5c   :  { %1450 = vmatpush.bf16.msra.mxu1 %v3260_v29  ;;  %v4097_v24 = vld [vmem:[#allocation5 + $0x244] sm:$0xf]  ;;  %v3049_v26 = vld [vmem:[#allocation5 + $0x250] sm:$0xf0]  ;;  %v3452_v31 = vor.u32 %v4197_v22, %v3449_v23  ;;  %v4052_v18 = vld [vmem:[#allocation5 + $0xd4] sm:$0xf0] }
  0x5d   :  { %1431 = vmatpush.bf16.msra.mxu2 %v2892_v38  ;;  %1419 = vmatmul.bf16.vlgmr.msrb.gmra.mxu3 %v4575_v57  ;;  %v4129_v27 = vld [vmem:[#allocation5 + $0x344] sm:$0xf]  ;;  %v3177_v28 = vld [vmem:[#allocation5 + $0x350] sm:$0xf0]  ;;  %v3052_v32 = vor.u32 %v4097_v24, %v3049_v26  ;;  %v3119_v24 = vld [vmem:[#allocation5 + $0x2c8] sm:$0xf] }
  0x5e   :  { %1463 = vmatpush.bf16.msra.mxu3 %v3388_v33  ;;  %v4161_v29 = vld [vmem:[#allocation5 + $0x444] sm:$0xf]  ;;  %v3305_v30 = vld [vmem:[#allocation5 + $0x450] sm:$0xf0]  ;;  %v3180_v33 = vor.u32 %v4129_v27, %v3177_v28  ;;  %v4116_v26 = vld [vmem:[#allocation5 + $0x2d4] sm:$0xf0] }
  0x5f   :  { %1438 = vmatpush.bf16.msra.mxu0 %v3116_v43  ;;  %v4193_v35 = vld [vmem:[#allocation5 + $0x544] sm:$0xf]  ;;  %v3433_v36 = vld [vmem:[#allocation5 + $0x550] sm:$0xf0]  ;;  %v3308_v38 = vor.u32 %v4161_v29, %v3305_v30  ;;  %v3247_v27 = vld [vmem:[#allocation5 + $0x3c8] sm:$0xf] }
  0x60   :  { %1451 = vmatpush.bf16.msra.mxu1 %v3244_v44  ;;  %1432 = vmatmul.bf16.vlgmr.msra.gmra.mxu2 %v4581_v9  ;;  %v4093_v37 = vld [vmem:[#allocation5 + $0x224] sm:$0xf]  ;;  %v3033_v40 = vld [vmem:[#allocation5 + $0x230] sm:$0xf0]  ;;  %v3436_v45 = vor.u32 %v4193_v35, %v3433_v36  ;;  %v4148_v28 = vld [vmem:[#allocation5 + $0x3d4] sm:$0xf0]  ;;  %v3120_v35 = vor.u32 %v4116_v26, %v3119_v24 }
  0x61   :  { %1476 = vmatpush.bf16.msrb.mxu2 %v3516_v42  ;;  %v4125_v41 = vld [vmem:[#allocation5 + $0x324] sm:$0xf]  ;;  %v3161_v42 = vld [vmem:[#allocation5 + $0x330] sm:$0xf0]  ;;  %v3036_v50 = vor.u32 %v4093_v37, %v3033_v40  ;;  %v2847_v30 = vld [vmem:[#allocation5 + $0xa8] sm:$0xf]  ;;  %v3248_v36 = vor.u32 %v4148_v28, %v3247_v27 }
  0x62   :  { %1464 = vmatpush.bf16.msra.mxu3 %v3372_v49  ;;  %v4157_v43 = vld [vmem:[#allocation5 + $0x424] sm:$0xf]  ;;  %v3289_v44 = vld [vmem:[#allocation5 + $0x430] sm:$0xf0]  ;;  %v3164_v51 = vor.u32 %v4125_v41, %v3161_v42  ;;  %v3103_v37 = vld [vmem:[#allocation5 + $0x2a8] sm:$0xf] }
  0x63   :  { %1439 = vmatpush.bf16.msra.mxu0 %v3100_v58  ;;  %v4189_v46 = vld [vmem:[#allocation5 + $0x524] sm:$0xf]  ;;  %v3417_v47 = vld [vmem:[#allocation5 + $0x530] sm:$0xf0]  ;;  %v4112_v40 = vld [vmem:[#allocation5 + $0x2b4] sm:$0xf0] }
  0x64   :  { %1452 = vmatpush.bf16.msra.mxu1 %v3228_v59  ;;  %v4089_v49 = vld [vmem:[#allocation5 + $0x204] sm:$0xf]  ;;  %v3017_v52 = vld [vmem:[#allocation5 + $0x210] sm:$0xf0]  ;;  %v3231_v41 = vld [vmem:[#allocation5 + $0x3a8] sm:$0xf] }
  0x65   :  { %1477 = vmatpush.bf16.msrb.mxu2 %v3500_v56  ;;  %v4121_v54 = vld [vmem:[#allocation5 + $0x304] sm:$0xf]  ;;  %v3145_v55 = vld [vmem:[#allocation5 + $0x310] sm:$0xf0]  ;;  %v3292_v56 = vor.u32 %v4157_v43, %v3289_v44  ;;  %v3020_v4 = vor.u32 %v4089_v49, %v3017_v52  ;;  %v4144_v42 = vld [vmem:[#allocation5 + $0x3b4] sm:$0xf0]  ;;  %v3104_v49 = vor.u32 %v4112_v40, %v3103_v37 }
  0x66   :  { %1465 = vmatpush.bf16.msra.mxu3 %v3356_v0  ;;  %v4153_v58 = vld [vmem:[#allocation5 + $0x404] sm:$0xf]  ;;  %v3273_v59 = vld [vmem:[#allocation5 + $0x410] sm:$0xf0]  ;;  %v3420_v0 = vor.u32 %v4189_v46, %v3417_v47  ;;  %v3148_v5 = vor.u32 %v4121_v54, %v3145_v55  ;;  %v2831_v44 = vld [vmem:[#allocation5 + $0x88] sm:$0xf] }
  0x67   :  { %1440 = vmatpush.bf16.msra.mxu0 %v3084_v7  ;;  %v4217_v2 = vld [vmem:[#allocation5 + $0x604] sm:$0xf]  ;;  %v3529_v3 = vld [vmem:[#allocation5 + $0x610] sm:$0xf0]  ;;  %v3276_v10 = vor.u32 %v4153_v58, %v3273_v59  ;;  %v2959_v46 = vld [vmem:[#allocation5 + $0x188] sm:$0xf] }
  0x68   :  { %1453 = vmatpush.bf16.msra.mxu1 %v3212_v8  ;;  %v3401_v7 = vld [vmem:[#allocation5 + $0x510] sm:$0xf0]  ;;  %v3135_v8 = vld [vmem:[#allocation5 + $0x2e8] sm:$0xf]  ;;  %v3532_v16 = vor.u32 %v4217_v2, %v3529_v3  ;;  %v4076_v47 = vld [vmem:[#allocation5 + $0x194] sm:$0xf0] }
  0x69   :  { %1478 = vmatpush.bf16.msrb.mxu2 %v3484_v6  ;;  %v4185_v6 = vld [vmem:[#allocation5 + $0x504] sm:$0xf]  ;;  %v3136_v22 = vor.u32 %v4120_v12, %v3135_v8  ;;  %v4108_v54 = vld [vmem:[#allocation5 + $0x294] sm:$0xf0]  ;;  %v3215_v55 = vld [vmem:[#allocation5 + $0x388] sm:$0xf]  ;;  %v2960_v58 = vor.u32 %v4076_v47, %v2959_v46 }
  0x6a   :  { %1466 = vmatpush.bf16.msra.mxu3 %v3340_v13  ;;  %v3263_v13 = vld [vmem:[#allocation5 + $0x3e8] sm:$0xf]  ;;  %v4040_v61 = vld [vmem:[#allocation5 + $0x74] sm:$0xf0] }
  0x6b   :  { %1441 = vmatpush.bf16.msra.mxu0 %v3068_v20  ;;  %v2991_v20 = vld [vmem:[#allocation5 + $0x1c8] sm:$0xf]  ;;  %v3264_v23 = vor.u32 %v4152_v14, %v3263_v13  ;;  %v4072_v63 = vld [vmem:[#allocation5 + $0x174] sm:$0xf0] }
  0x6c   :  { %1454 = vmatpush.bf16.msra.mxu1 %v3196_v21  ;;  %v4084_v21 = vld [vmem:[#allocation5 + $0x1d4] sm:$0xf0]  ;;  %v2815_v59 = vld [vmem:[#allocation5 + $0x68] sm:$0xf] }
  0x6d   :  { %1479 = vmatpush.bf16.msrb.mxu2 %v3468_v19  ;;  %v3404_v19 = vor.u32 %v4185_v6, %v3401_v7  ;;  %v2992_v29 = vor.u32 %v4084_v21, %v2991_v20  ;;  %v2943_v62 = vld [vmem:[#allocation5 + $0x168] sm:$0xf]  ;;  %v2816_v3 = vor.u32 %v4040_v61, %v2815_v59  ;;  %v4136_v6 = vld [vmem:[#allocation5 + $0x374] sm:$0xf0] }
  0x6e   :  { %1467 = vmatpush.bf16.msra.mxu3 %v3324_v25  ;;  %v2864_v25 = vor.u32 %v4052_v18, %v2863_v17  ;;  %v3071_v2 = vld [vmem:[#allocation5 + $0x268] sm:$0xf]  ;;  %v2944_v7 = vor.u32 %v4072_v63, %v2943_v62  ;;  %v4068_v12 = vld [vmem:[#allocation5 + $0x154] sm:$0xf0] }
  0x6f   :  { %1442 = vmatpush.bf16.msra.mxu0 %v3052_v32  ;;  %v2975_v32 = vld [vmem:[#allocation5 + $0x1a8] sm:$0xf]  ;;  %v4100_v17 = vld [vmem:[#allocation5 + $0x254] sm:$0xf0] }
  0x70   :  { %1455 = vmatpush.bf16.msra.mxu1 %v3180_v33  ;;  %v4080_v33 = vld [vmem:[#allocation5 + $0x1b4] sm:$0xf0]  ;;  %v2799_v8 = vld [vmem:[#allocation5 + $0x48] sm:$0xf] }
  0x71   :  { %1480 = vmatpush.bf16.msrb.mxu2 %v3452_v31  ;;  %v4048_v31 = vld [vmem:[#allocation5 + $0xb4] sm:$0xf0]  ;;  %v2976_v43 = vor.u32 %v4080_v33, %v2975_v32  ;;  %v3183_v18 = vld [vmem:[#allocation5 + $0x348] sm:$0xf] }
  0x72   :  { %1468 = vmatpush.bf16.msra.mxu3 %v3308_v38  ;;  %v2848_v38 = vor.u32 %v4048_v31, %v2847_v30  ;;  %v2783_v21 = vld [vmem:[#allocation5 + $0x28] sm:$0xf]  ;;  %v4064_v24 = vld [vmem:[#allocation5 + $0x134] sm:$0xf0] }
  0x73   :  { %1443 = vmatpush.bf16.msra.mxu0 %v3036_v50  ;;  %v3232_v50 = vor.u32 %v4144_v42, %v3231_v41  ;;  %v3039_v27 = vld [vmem:[#allocation5 + $0x228] sm:$0xf]  ;;  %v4096_v28 = vld [vmem:[#allocation5 + $0x234] sm:$0xf0] }
  0x74   :  { %1456 = vmatpush.bf16.msra.mxu1 %v3164_v51  ;;  %v3087_v51 = vld [vmem:[#allocation5 + $0x288] sm:$0xf]  ;;  %v4128_v31 = vld [vmem:[#allocation5 + $0x334] sm:$0xf0]  ;;  %v3040_v42 = vor.u32 %v4096_v28, %v3039_v27 }
  0x75   :  { %1481 = vmatpush.bf16.msrb.mxu2 %v3436_v45  ;;  %v4044_v45 = vld [vmem:[#allocation5 + $0x94] sm:$0xf0]  ;;  %v3167_v30 = vld [vmem:[#allocation5 + $0x328] sm:$0xf] }
  0x76   :  { %1469 = vmatpush.bf16.msra.mxu3 %v3292_v56  ;;  %v2832_v52 = vor.u32 %v4044_v45, %v2831_v44  ;;  %v4140_v56 = vld [vmem:[#allocation5 + $0x394] sm:$0xf0]  ;;  %v2767_v32 = vld [vmem:[#allocation5 + $0x8] sm:$0xf] }
  0x77   :  { %1444 = vmatpush.bf16.msra.mxu0 %v3020_v4  ;;  %v3216_v1 = vor.u32 %v4140_v56, %v3215_v55  ;;  %v4104_v4 = vld [vmem:[#allocation5 + $0x274] sm:$0xf0]  ;;  %v3519_v41 = vld [vmem:[#allocation5 + $0x5e8] sm:$0xf]  ;;  %v2881_v55 = vld [vmem:[#allocation5 + $0xf8] sm:$0xf0] }
  0x78   :  { %1457 = vmatpush.bf16.msra.mxu1 %v3148_v5  ;;  %v3199_v5 = vld [vmem:[#allocation5 + $0x368] sm:$0xf]  ;;  %v3072_v13 = vor.u32 %v4104_v4, %v3071_v2  ;;  %v4060_v37 = vld [vmem:[#allocation5 + $0x114] sm:$0xf0] }
  0x79   :  { %1482 = vmatpush.bf16.msrb.mxu2 %v3420_v0  ;;  %v3088_v0 = vor.u32 %v4108_v54, %v3087_v51  ;;  %v3200_v14 = vor.u32 %v4136_v6, %v3199_v5  ;;  %v4184_v40 = vld [vmem:[#allocation5 + $0x4f4] sm:$0xf0]  ;;  %v3023_v45 = vld [vmem:[#allocation5 + $0x208] sm:$0xf]  ;;  %v4054_v51 = vld [vmem:[#allocation5 + $0xec] sm:$0xf] }
  0x7a   :  { %1470 = vmatpush.bf16.msra.mxu3 %v3276_v10  ;;  %1445 = vmatmul.bf16.vlgmr.msra.gmra.mxu0 %v4573_v53  ;;  %v4036_v10 = vld [vmem:[#allocation5 + $0x54] sm:$0xf0]  ;;  %v3535_v56 = vld [vmem:[#allocation5 + $0x608] sm:$0xf]  ;;  %v4086_v5 = vld [vmem:[#allocation5 + $0x1ec] sm:$0xf] }
  0x7b   :  { %1496 = vmatpush.bf16.msrb.mxu0 %v3532_v16  ;;  %1458 = vmatmul.bf16.vlgmr.msra.gmra.mxu1 %v4577_v60  ;;  %v2800_v16 = vor.u32 %v4036_v10, %v2799_v8  ;;  %v4216_v44 = vld [vmem:[#allocation5 + $0x5f4] sm:$0xf0]  ;;  %v3375_v61 = vld [vmem:[#allocation5 + $0x4c8] sm:$0xf]  ;;  %v3009_v6 = vld [vmem:[#allocation5 + $0x1f8] sm:$0xf0] }
  0x7c   :  { %1502 = vmatpush.bf16.msrb.mxu1 %v2880_v11  ;;  %v2927_v11 = vld [vmem:[#allocation5 + $0x148] sm:$0xf]  ;;  %v4092_v46 = vld [vmem:[#allocation5 + $0x214] sm:$0xf0]  ;;  %v3520_v59 = vor.u32 %v4216_v44, %v3519_v41  ;;  %v4050_v8 = vld [vmem:[#allocation5 + $0xcc] sm:$0xf] }
  0x7d   :  { %1483 = vmatpush.bf16.msrb.mxu2 %v3404_v19  ;;  %1471 = vmatmul.bf16.vlgmr.msra.gmra.mxu3 %v4589_v34  ;;  %v4132_v19 = vld [vmem:[#allocation5 + $0x354] sm:$0xf0]  ;;  %v2928_v20 = vor.u32 %v4068_v12, %v2927_v11  ;;  %v3024_v63 = vor.u32 %v4092_v46, %v3023_v45  ;;  %v2865_v10 = vld [vmem:[#allocation5 + $0xd8] sm:$0xf0]  ;;  %v3359_v12 = vld [vmem:[#allocation5 + $0x4a8] sm:$0xf] }
  0x7e   :  { %1515 = vmatpush.bf16.msrb.mxu3 %v3008_v15  ;;  %v3055_v15 = vld [vmem:[#allocation5 + $0x248] sm:$0xf]  ;;  %v3184_v26 = vor.u32 %v4132_v19, %v3183_v18  ;;  %v4180_v62 = vld [vmem:[#allocation5 + $0x4d4] sm:$0xf0]  ;;  %v4082_v18 = vld [vmem:[#allocation5 + $0x1cc] sm:$0xf] }
  0x7f   :  { %1528 = vmatpush.bf16.msra.mxu0 %v3136_v22  ;;  %v4032_v22 = vld [vmem:[#allocation5 + $0x34] sm:$0xf0]  ;;  %v2993_v19 = vld [vmem:[#allocation5 + $0x1d8] sm:$0xf0]  ;;  %v3471_v27 = vld [vmem:[#allocation5 + $0x588] sm:$0xf] }
  0x80   :  { %1503 = vmatpush.bf16.msrb.mxu1 %v2864_v25  ;;  %1484 = vmatmul.bf16.vlgmr.msrb.gmra.mxu2 %v4591_v39  ;;  %v3056_v25 = vor.u32 %v4100_v17, %v3055_v15  ;;  %v4212_v2 = vld [vmem:[#allocation5 + $0x5d4] sm:$0xf0]  ;;  %v3487_v15 = vld [vmem:[#allocation5 + $0x5a8] sm:$0xf]  ;;  %v2868_v17 = vor.u32 %v4050_v8, %v2865_v10  ;;  %v4074_v44 = vld [vmem:[#allocation5 + $0x18c] sm:$0xf] }
  0x81   :  { %1541 = vmatpush.bf16.msra.mxu2 %v3264_v23  ;;  %v2911_v23 = vld [vmem:[#allocation5 + $0x128] sm:$0xf]  ;;  %v4204_v28 = vld [vmem:[#allocation5 + $0x594] sm:$0xf0]  ;;  %v2961_v45 = vld [vmem:[#allocation5 + $0x198] sm:$0xf0] }
  0x82   :  { %1516 = vmatpush.bf16.msrb.mxu3 %v2992_v29  ;;  %v2784_v29 = vor.u32 %v4032_v22, %v2783_v21  ;;  %v2912_v33 = vor.u32 %v4064_v24, %v2911_v23  ;;  %v4046_v21 = vld [vmem:[#allocation5 + $0xac] sm:$0xf]  ;;  %v2849_v22 = vld [vmem:[#allocation5 + $0xb8] sm:$0xf0]  ;;  %v3343_v24 = vld [vmem:[#allocation5 + $0x488] sm:$0xf] }
  0x83   :  { %1529 = vmatpush.bf16.msra.mxu0 %v3120_v35  ;;  %v4028_v35 = vld [vmem:[#allocation5 + $0x14] sm:$0xf0]  ;;  %v3455_v41 = vld [vmem:[#allocation5 + $0x568] sm:$0xf]  ;;  %v4066_v8 = vld [vmem:[#allocation5 + $0x14c] sm:$0xf] }
  0x84   :  { %1504 = vmatpush.bf16.msrb.mxu1 %v2848_v38  ;;  %v3391_v38 = vld [vmem:[#allocation5 + $0x4e8] sm:$0xf]  ;;  %v2768_v47 = vor.u32 %v4028_v35, %v2767_v32  ;;  %v2833_v35 = vld [vmem:[#allocation5 + $0x98] sm:$0xf0] }
  0x85   :  { %1542 = vmatpush.bf16.msra.mxu2 %v3248_v36  ;;  %v2895_v36 = vld [vmem:[#allocation5 + $0x108] sm:$0xf]  ;;  %v3392_v54 = vor.u32 %v4184_v40, %v3391_v38  ;;  %v4168_v38 = vld [vmem:[#allocation5 + $0x474] sm:$0xf0]  ;;  %v2929_v10 = vld [vmem:[#allocation5 + $0x158] sm:$0xf0] }
  0x86   :  { %1517 = vmatpush.bf16.msrb.mxu3 %v2976_v43  ;;  %v3168_v43 = vor.u32 %v4128_v31, %v3167_v30  ;;  %v4078_v30 = vld [vmem:[#allocation5 + $0x1ac] sm:$0xf]  ;;  %v2977_v31 = vld [vmem:[#allocation5 + $0x1b8] sm:$0xf0] }
  0x87   :  { %1530 = vmatpush.bf16.msra.mxu0 %v3104_v49  ;;  %v3151_v49 = vld [vmem:[#allocation5 + $0x308] sm:$0xf]  ;;  %v2980_v40 = vor.u32 %v4078_v30, %v2977_v31 }
  0x88   :  { %1505 = vmatpush.bf16.msrb.mxu1 %v2832_v52  ;;  %v2896_v52 = vor.u32 %v4060_v37, %v2895_v36  ;;  %v3472_v36 = vor.u32 %v4204_v28, %v3471_v27  ;;  %v3327_v37 = vld [vmem:[#allocation5 + $0x468] sm:$0xf]  ;;  %v4026_v28 = vld [vmem:[#allocation5 + $0xc] sm:$0xf] }
  0x89   :  { %1543 = vmatpush.bf16.msra.mxu2 %v3232_v50  ;;  %v4124_v50 = vld [vmem:[#allocation5 + $0x314] sm:$0xf0]  ;;  %v3328_v46 = vor.u32 %v4168_v38, %v3327_v37  ;;  %v4114_v37 = vld [vmem:[#allocation5 + $0x2cc] sm:$0xf]  ;;  %v3121_v38 = vld [vmem:[#allocation5 + $0x2d8] sm:$0xf0] }
  0x8a   :  { %1518 = vmatpush.bf16.msrb.mxu3 %v2960_v58  ;;  %3542 = vmatmul.msk.bf16.vlgmr.msrb.gmra.mxu0 %vm1316_vm0, %v4585_v48  ;;  %v4220_v58 = vld [vmem:[#allocation5 + $0x614] sm:$0xf0] }
  0x8b   :  { %1531 = vmatpush.bf16.msra.mxu0 %v3088_v0  ;;  %v3152_v0 = vor.u32 %v4124_v50, %v3151_v49  ;;  %v3536_v4 = vor.u32 %v4220_v58, %v3535_v56  ;;  %v2817_v49 = vld [vmem:[#allocation5 + $0x78] sm:$0xf0]  ;;  %v4196_v56 = vld [vmem:[#allocation5 + $0x554] sm:$0xf0] }
  0x8c   :  { %1506 = vmatpush.bf16.msrb.mxu1 %v2816_v3  ;;  %v2884_v3 = vor.u32 %v4054_v51, %v2881_v55  ;;  %v3311_v51 = vld [vmem:[#allocation5 + $0x448] sm:$0xf] }
  0x8d   :  { %1544 = vmatpush.bf16.msra.mxu2 %v3216_v1  ;;  %v3503_v1 = vld [vmem:[#allocation5 + $0x5c8] sm:$0xf] }
  0x8e   :  { %1519 = vmatpush.bf16.msrb.mxu3 %v2944_v7  ;;  %v3376_v7 = vor.u32 %v4180_v62, %v3375_v61  ;;  %v3504_v11 = vor.u32 %v4212_v2, %v3503_v1  ;;  %v3439_v55 = vld [vmem:[#allocation5 + $0x548] sm:$0xf]  ;;  %v2945_v61 = vld [vmem:[#allocation5 + $0x178] sm:$0xf0] }
  0x8f   :  { %1532 = vmatpush.bf16.msra.mxu0 %v3072_v13  ;;  %v4176_v13 = vld [vmem:[#allocation5 + $0x4b4] sm:$0xf0]  ;;  %v3440_v1 = vor.u32 %v4196_v56, %v3439_v55  ;;  %v3295_v2 = vld [vmem:[#allocation5 + $0x428] sm:$0xf]  ;;  %v4110_v55 = vld [vmem:[#allocation5 + $0x2ac] sm:$0xf] }
  0x90   :  { %1507 = vmatpush.bf16.msrb.mxu1 %v2800_v16  ;;  %v4208_v16 = vld [vmem:[#allocation5 + $0x5b4] sm:$0xf0]  ;;  %v3105_v56 = vld [vmem:[#allocation5 + $0x2b8] sm:$0xf0] }
  0x91   :  { %1545 = vmatpush.bf16.msra.mxu2 %v3200_v14  ;;  %v3012_v14 = vor.u32 %v4086_v5, %v3009_v6  ;;  %v3488_v23 = vor.u32 %v4208_v16, %v3487_v15  ;;  %v3423_v5 = vld [vmem:[#allocation5 + $0x528] sm:$0xf]  ;;  %v4192_v6 = vld [vmem:[#allocation5 + $0x534] sm:$0xf0] }
  0x92   :  { %1520 = vmatpush.bf16.msrb.mxu3 %v2928_v20  ;;  %v3360_v20 = vor.u32 %v4176_v13, %v3359_v12  ;;  %v4030_v12 = vld [vmem:[#allocation5 + $0x2c] sm:$0xf]  ;;  %v2785_v13 = vld [vmem:[#allocation5 + $0x38] sm:$0xf0]  ;;  %v3424_v15 = vor.u32 %v4192_v6, %v3423_v5  ;;  %v4156_v16 = vld [vmem:[#allocation5 + $0x414] sm:$0xf0] }
  0x93   :  { %1533 = vmatpush.bf16.msra.mxu0 %v3056_v25  ;;  %v4172_v25 = vld [vmem:[#allocation5 + $0x494] sm:$0xf0]  ;;  %v4106_v5 = vld [vmem:[#allocation5 + $0x28c] sm:$0xf]  ;;  %v3089_v6 = vld [vmem:[#allocation5 + $0x298] sm:$0xf0] }
  0x94   :  { %1508 = vmatpush.bf16.msrb.mxu1 %v2784_v29  ;;  %v2852_v29 = vor.u32 %v4046_v21, %v2849_v22  ;;  %v3344_v32 = vor.u32 %v4172_v25, %v3343_v24  ;;  %v3137_v21 = vld [vmem:[#allocation5 + $0x2f8] sm:$0xf0]  ;;  %v4150_v22 = vld [vmem:[#allocation5 + $0x3ec] sm:$0xf] }
  0x95   :  { %1546 = vmatpush.bf16.msra.mxu2 %v3184_v26  ;;  %v2996_v26 = vor.u32 %v4082_v18, %v2993_v19  ;;  %v4188_v18 = vld [vmem:[#allocation5 + $0x514] sm:$0xf0]  ;;  %v2932_v19 = vor.u32 %v4066_v8, %v2929_v10  ;;  %v3265_v24 = vld [vmem:[#allocation5 + $0x3f8] sm:$0xf0]  ;;  %v4062_v25 = vld [vmem:[#allocation5 + $0x12c] sm:$0xf] }
  0x96   :  { %1521 = vmatpush.bf16.msrb.mxu3 %v2912_v33  ;;  %v4042_v33 = vld [vmem:[#allocation5 + $0x8c] sm:$0xf]  ;;  %v3217_v10 = vld [vmem:[#allocation5 + $0x398] sm:$0xf0] }
  0x97   :  { %1534 = vmatpush.bf16.msra.mxu0 %v3040_v42  ;;  %v4200_v42 = vld [vmem:[#allocation5 + $0x574] sm:$0xf0]  ;;  %v4138_v8 = vld [vmem:[#allocation5 + $0x38c] sm:$0xf] }
  0x98   :  { %1509 = vmatpush.bf16.msrb.mxu1 %v2768_v47  ;;  %v4038_v47 = vld [vmem:[#allocation5 + $0x6c] sm:$0xf]  ;;  %v3456_v50 = vor.u32 %v4200_v42, %v3455_v41  ;;  %v3249_v42 = vld [vmem:[#allocation5 + $0x3d8] sm:$0xf0] }
  0x99   :  { %1547 = vmatpush.bf16.msra.mxu2 %v3168_v43  ;;  %v2836_v43 = vor.u32 %v4042_v33, %v2833_v35  ;;  %v2820_v58 = vor.u32 %v4038_v47, %v2817_v49  ;;  %v3393_v33 = vld [vmem:[#allocation5 + $0x4f8] sm:$0xf0]  ;;  %v3268_v35 = vor.u32 %v4150_v22, %v3265_v24  ;;  %v3124_v49 = vor.u32 %v4114_v37, %v3121_v38  ;;  %v4202_v24 = vld [vmem:[#allocation5 + $0x58c] sm:$0xf] }
  0x9a   :  { %1522 = vmatpush.bf16.msrb.mxu3 %v2896_v52  ;;  %v4164_v52 = vld [vmem:[#allocation5 + $0x454] sm:$0xf0]  ;;  %v3521_v47 = vld [vmem:[#allocation5 + $0x5f8] sm:$0xf0]  ;;  %v4198_v37 = vld [vmem:[#allocation5 + $0x56c] sm:$0xf] }
  0x9b   :  { %1535 = vmatpush.bf16.msra.mxu0 %v3024_v63  ;;  %1510 = vmatmul.bf16.vlgmr.msrb.gmra.mxu1 %v4575_v57  ;;  %v3312_v62 = vor.u32 %v4164_v52, %v3311_v51  ;;  %v4034_v63 = vld [vmem:[#allocation5 + $0x4c] sm:$0xf]  ;;  %v3377_v51 = vld [vmem:[#allocation5 + $0x4d8] sm:$0xf0] }
  0x9c   :  { %1554 = vmatpush.bf16.msra.mxu1 %v3392_v54  ;;  %v2964_v54 = vor.u32 %v4074_v44, %v2961_v45  ;;  %v2897_v44 = vld [vmem:[#allocation5 + $0x118] sm:$0xf0] }
  0x9d   :  { %1548 = vmatpush.bf16.msra.mxu2 %v3152_v0  ;;  %1523 = vmatmul.bf16.vlgmr.msrb.gmra.mxu3 %v4581_v9  ;;  %v2801_v0 = vld [vmem:[#allocation5 + $0x58] sm:$0xf0] }
  0x9e   :  { %1567 = vmatpush.bf16.msra.mxu3 %v3520_v59  ;;  %1536 = vmatmul.bf16.vlgmr.msra.gmra.mxu0 %v4573_v53  ;;  %v4070_v59 = vld [vmem:[#allocation5 + $0x16c] sm:$0xf]  ;;  %v3201_v22 = vld [vmem:[#allocation5 + $0x378] sm:$0xf0] }
  0x9f   :  { %1587 = vmatpush.bf16.msrb.mxu0 %v3536_v4  ;;  %v2948_v4 = vor.u32 %v4070_v59, %v2945_v61  ;;  %v4142_v59 = vld [vmem:[#allocation5 + $0x3ac] sm:$0xf]  ;;  %v3233_v61 = vld [vmem:[#allocation5 + $0x3b8] sm:$0xf0] }
  0xa0   :  { %1555 = vmatpush.bf16.msra.mxu1 %v3376_v7  ;;  %1549 = vmatmul.bf16.vlgmr.msra.gmra.mxu2 %v4577_v60  ;;  %v2804_v7 = vor.u32 %v4034_v63, %v2801_v0  ;;  %v4210_v63 = vld [vmem:[#allocation5 + $0x5cc] sm:$0xf]  ;;  %v3505_v0 = vld [vmem:[#allocation5 + $0x5d8] sm:$0xf0] }
  0xa1   :  { %1593 = vmatpush.bf16.msrb.mxu2 %v2884_v3  ;;  %v4160_v3 = vld [vmem:[#allocation5 + $0x434] sm:$0xf0]  ;;  %v3457_v38 = vld [vmem:[#allocation5 + $0x578] sm:$0xf0] }
  0xa2   :  { %1568 = vmatpush.bf16.msra.mxu3 %v3504_v11  ;;  %v3296_v11 = vor.u32 %v4160_v3, %v3295_v2  ;;  %v4174_v2 = vld [vmem:[#allocation5 + $0x4ac] sm:$0xf]  ;;  %v3361_v3 = vld [vmem:[#allocation5 + $0x4b8] sm:$0xf0] }
  0xa3   :  { %1606 = vmatpush.bf16.msra.mxu0 %v3012_v14  ;;  %v3279_v14 = vld [vmem:[#allocation5 + $0x408] sm:$0xf] }
  0xa4   :  { %1556 = vmatpush.bf16.msra.mxu1 %v3360_v20  ;;  %v4118_v20 = vld [vmem:[#allocation5 + $0x2ec] sm:$0xf]  ;;  %v3280_v27 = vor.u32 %v4156_v16, %v3279_v14  ;;  %v3092_v14 = vor.u32 %v4106_v5, %v3089_v6  ;;  %v3345_v16 = vld [vmem:[#allocation5 + $0x498] sm:$0xf0] }
  0xa5   :  { %1594 = vmatpush.bf16.msrb.mxu2 %v2868_v17  ;;  %v3407_v17 = vld [vmem:[#allocation5 + $0x508] sm:$0xf]  ;;  %v3140_v31 = vor.u32 %v4118_v20, %v3137_v21  ;;  %v4134_v21 = vld [vmem:[#allocation5 + $0x36c] sm:$0xf] }
  0xa6   :  { %1569 = vmatpush.bf16.msra.mxu3 %v3488_v23  ;;  %v2788_v23 = vor.u32 %v4030_v12, %v2785_v13  ;;  %v3408_v30 = vor.u32 %v4188_v18, %v3407_v17  ;;  %v4206_v12 = vld [vmem:[#allocation5 + $0x5ac] sm:$0xf]  ;;  %v3489_v13 = vld [vmem:[#allocation5 + $0x5b8] sm:$0xf0]  ;;  %v3220_v17 = vor.u32 %v4138_v8, %v3217_v10 }
  0xa7   :  { %1607 = vmatpush.bf16.msra.mxu0 %v2996_v26  ;;  %v2913_v26 = vld [vmem:[#allocation5 + $0x138] sm:$0xf0]  ;;  %v4102_v18 = vld [vmem:[#allocation5 + $0x26c] sm:$0xf]  ;;  %v3492_v20 = vor.u32 %v4206_v12, %v3489_v13 }
  0xa8   :  { %1557 = vmatpush.bf16.msra.mxu1 %v3344_v32  ;;  %v4182_v32 = vld [vmem:[#allocation5 + $0x4ec] sm:$0xf]  ;;  %v3425_v13 = vld [vmem:[#allocation5 + $0x538] sm:$0xf0] }
  0xa9   :  { %1595 = vmatpush.bf16.msrb.mxu2 %v2852_v29  ;;  %v2769_v29 = vld [vmem:[#allocation5 + $0x18] sm:$0xf0]  ;;  %v3396_v45 = vor.u32 %v4182_v32, %v3393_v33  ;;  %v4130_v33 = vld [vmem:[#allocation5 + $0x34c] sm:$0xf] }
  0xaa   :  { %1570 = vmatpush.bf16.msra.mxu3 %v3472_v36  ;;  %v2916_v36 = vor.u32 %v4062_v25, %v2913_v26  ;;  %v2772_v41 = vor.u32 %v4026_v28, %v2769_v29  ;;  %v3473_v25 = vld [vmem:[#allocation5 + $0x598] sm:$0xf0]  ;;  %v4098_v29 = vld [vmem:[#allocation5 + $0x24c] sm:$0xf] }
  0xab   :  { %1608 = vmatpush.bf16.msra.mxu0 %v2980_v40  ;;  %v4146_v40 = vld [vmem:[#allocation5 + $0x3cc] sm:$0xf]  ;;  %v3329_v28 = vld [vmem:[#allocation5 + $0x478] sm:$0xf0] }
  0xac   :  { %1558 = vmatpush.bf16.msra.mxu1 %v3328_v46  ;;  %v4214_v46 = vld [vmem:[#allocation5 + $0x5ec] sm:$0xf]  ;;  %v3252_v52 = vor.u32 %v4146_v40, %v3249_v42 }
  0xad   :  { %1596 = vmatpush.bf16.msrb.mxu2 %v2836_v43  ;;  %v4058_v43 = vld [vmem:[#allocation5 + $0x10c] sm:$0xf] }
  0xae   :  { %1571 = vmatpush.bf16.msra.mxu3 %v3456_v50  ;;  %3543 = vmatmul.msk.bf16.vlgmr.msrb.gmra.mxu0 %vm1316_vm0, %v4585_v48  ;;  %v4178_v50 = vld [vmem:[#allocation5 + $0x4cc] sm:$0xf] }
  0xaf   :  { %1609 = vmatpush.bf16.msra.mxu0 %v2964_v54  ;;  %v2900_v54 = vor.u32 %v4058_v43, %v2897_v44  ;;  %v4162_v42 = vld [vmem:[#allocation5 + $0x44c] sm:$0xf]  ;;  %v3313_v43 = vld [vmem:[#allocation5 + $0x458] sm:$0xf0] }
  0xb0   :  { %1559 = vmatpush.bf16.msra.mxu1 %v3312_v62  ;;  %v3380_v62 = vor.u32 %v4178_v50, %v3377_v51  ;;  %v4126_v50 = vld [vmem:[#allocation5 + $0x32c] sm:$0xf]  ;;  %v3169_v51 = vld [vmem:[#allocation5 + $0x338] sm:$0xf0] }
  0xb1   :  { %1597 = vmatpush.bf16.msrb.mxu2 %v2820_v58  ;;  %v3524_v58 = vor.u32 %v4214_v46, %v3521_v47  ;;  %v4094_v46 = vld [vmem:[#allocation5 + $0x22c] sm:$0xf]  ;;  %v3041_v47 = vld [vmem:[#allocation5 + $0x238] sm:$0xf0] }
  0xb2   :  { %1572 = vmatpush.bf16.msra.mxu3 %v3440_v1  ;;  %v3108_v1 = vor.u32 %v4110_v55, %v3105_v56  ;;  %v4194_v55 = vld [vmem:[#allocation5 + $0x54c] sm:$0xf]  ;;  %v3441_v56 = vld [vmem:[#allocation5 + $0x558] sm:$0xf0] }
  0xb3   :  { %1610 = vmatpush.bf16.msra.mxu0 %v2948_v4  ;;  %v3236_v4 = vor.u32 %v4142_v59, %v3233_v61  ;;  %v3044_v59 = vor.u32 %v4094_v46, %v3041_v47  ;;  %v4158_v61 = vld [vmem:[#allocation5 + $0x42c] sm:$0xf]  ;;  %v4261_v46 = vld [vmem:[#allocation8 + $0x140] sm:$0xf0] }
  0xb4   :  { %1560 = vmatpush.bf16.msra.mxu1 %v3296_v11  ;;  %v3364_v11 = vor.u32 %v4174_v2, %v3361_v3  ;;  %v4122_v2 = vld [vmem:[#allocation5 + $0x30c] sm:$0xf]  ;;  %v3153_v3 = vld [vmem:[#allocation5 + $0x318] sm:$0xf0] }
  0xb5   :  { %1598 = vmatpush.bf16.msrb.mxu2 %v2804_v7  ;;  %v3508_v7 = vor.u32 %v4210_v63, %v3505_v0  ;;  %v4090_v63 = vld [vmem:[#allocation5 + $0x20c] sm:$0xf]  ;;  %v3172_v0 = vor.u32 %v4126_v50, %v3169_v51 }
  0xb6   :  { %1573 = vmatpush.bf16.msra.mxu3 %v3424_v15  ;;  %v4170_v15 = vld [vmem:[#allocation5 + $0x48c] sm:$0xf] }
  0xb7   :  { %1611 = vmatpush.bf16.msra.mxu0 %v2932_v19  ;;  %v3073_v19 = vld [vmem:[#allocation5 + $0x278] sm:$0xf0]  ;;  %v4615_v32 = vpop.f32.mrf.mxu1  ;;  %v3631_v5 = vld [vmem:[#allocation8 + $0xa8] sm:$0xf] }
  0xb8   :  { %1561 = vmatpush.bf16.msra.mxu1 %v3280_v27  ;;  %v3076_v26 = vor.u32 %v4102_v18, %v3073_v19  ;;  %v4166_v27 = vld [vmem:[#allocation5 + $0x46c] sm:$0xf]  ;;  %v3156_v19 = vor.u32 %v4122_v2, %v3153_v3  ;;  %v3571_v2 = vld [vmem:[#allocation8 + $0x30] sm:$0xf]  ;;  %v4228_v3 = vld [vmem:[#allocation8 + $0x38] sm:$0xf0] }
  0xb9   :  { %1599 = vmatpush.bf16.msrb.mxu2 %v2788_v23  ;;  %v4613_v23 = vpop.f32.mrf.mxu0  ;;  %v4218_v6 = vld [vmem:[#allocation5 + $0x60c] sm:$0xf] }
  0xba   :  { %1574 = vmatpush.bf16.msra.mxu3 %v3408_v30  ;;  %v3057_v30 = vld [vmem:[#allocation5 + $0x258] sm:$0xf0]  ;;  %v4190_v12 = vld [vmem:[#allocation5 + $0x52c] sm:$0xf] }
  0xbb   :  { %1612 = vmatpush.bf16.msra.mxu0 %v2916_v36  ;;  %1562 = vmatmul.bf16.vlgmr.msra.gmra.mxu1 %v4589_v34  ;;  %v3332_v36 = vor.u32 %v4166_v27, %v3329_v28  ;;  %v3619_v27 = vld [vmem:[#allocation8 + $0x90] sm:$0xf]  ;;  %v4240_v28 = vld [vmem:[#allocation8 + $0x98] sm:$0xf0] }
  0xbc   :  { %1619 = vmatpush.bf16.msrb.mxu1 %v3140_v31  ;;  %v3476_v31 = vor.u32 %v4202_v24, %v3473_v25  ;;  %v3428_v25 = vor.u32 %v4190_v12, %v3425_v13 }
  0xbd   :  { %1600 = vmatpush.bf16.msrb.mxu2 %v2772_v41  ;;  %1575 = vmatmul.bf16.vlgmr.msra.gmra.mxu3 %v4591_v39  ;;  %v3060_v41 = vor.u32 %v4098_v29, %v3057_v30  ;;  %v3409_v29 = vld [vmem:[#allocation5 + $0x518] sm:$0xf0] }
  0xbe   :  { %1632 = vmatpush.bf16.msrb.mxu3 %v3268_v35  ;;  %v3185_v35 = vld [vmem:[#allocation5 + $0x358] sm:$0xf0]  ;;  %v4617_v40 = vpop.f32.mrf.mxu2 }
  0xbf   :  { %1613 = vmatpush.bf16.msra.mxu0 %v2900_v54  ;;  %v3188_v44 = vor.u32 %v4130_v33, %v3185_v35  ;;  %v3316_v54 = vor.u32 %v4162_v42, %v3313_v43  ;;  %v1344_v8 = vpop.f32.mrf.mxu1  ;;  %v3715_v33 = vld [vmem:[#allocation8 + $0x150] sm:$0xf]  ;;  %v4264_v35 = vld [vmem:[#allocation8 + $0x158] sm:$0xf0] }
  0xc0   :  { %1620 = vmatpush.bf16.msrb.mxu1 %v3124_v49  ;;  %1601 = vmatmul.bf16.vlgmr.msrb.gmra.mxu2 %v4575_v57  ;;  %v3348_v57 = vor.u32 %v4170_v15, %v3345_v16  ;;  %v3460_v49 = vor.u32 %v4198_v37, %v3457_v38  ;;  %v4154_v16 = vld [vmem:[#allocation5 + $0x40c] sm:$0xf]  ;;  %v3607_v38 = vld [vmem:[#allocation8 + $0x78] sm:$0xf]  ;;  %v3716_v42 = vor.u32 %v4264_v35, %v3715_v33  ;;  %v3811_v35 = vld [vmem:[#allocation8 + $0x210] sm:$0xf] }
  0xc1   :  { %1645 = vmatpush.bf16.msra.mxu2 %v3396_v45  ;;  %v4619_v45 = vpop.f32.mrf.mxu3  ;;  %v3559_v8 = vld [vmem:[#allocation8 + $0x18] sm:$0xf] }
  0xc2   :  { %1633 = vmatpush.bf16.msrb.mxu3 %v3252_v52  ;;  %1614 = vmatmul.bf16.vlgmr.msra.gmra.mxu0 %v4581_v9  ;;  %v3204_v9 = vor.u32 %v4134_v21, %v3201_v22  ;;  %v1331_v52 = vpop.f32.mrf.mxu0  ;;  %v3727_v21 = vld [vmem:[#allocation8 + $0x168] sm:$0xf]  ;;  %v4267_v22 = vld [vmem:[#allocation8 + $0x170] sm:$0xf0] }
  0xc3   :  { %1658 = vmatpush.bf16.msrb.mxu0 %v3524_v58  ;;  %v4621_v58 = vld [vmem:[#allocation7] sm:$0xf]  ;;  %v3728_v30 = vor.u32 %v4267_v22, %v3727_v21  ;;  %v3691_v52 = vld [vmem:[#allocation8 + $0x120] sm:$0xf]  ;;  %v3823_v21 = vld [vmem:[#allocation8 + $0x228] sm:$0xf] }
  0xc4   :  { %1621 = vmatpush.bf16.msrb.mxu1 %v3108_v1  ;;  %v3025_v1 = vld [vmem:[#allocation5 + $0x218] sm:$0xf0]  ;;  %v304_v18 = vperm.slane %v4621_v58, 0  ;;  %v4291_v22 = vld [vmem:[#allocation8 + $0x230] sm:$0xf0] }
  0xc5   :  { %1646 = vmatpush.bf16.msra.mxu2 %v3380_v62  ;;  %v3297_v62 = vld [vmem:[#allocation5 + $0x438] sm:$0xf0]  ;;  %v3028_v15 = vor.u32 %v4090_v63, %v3025_v1  ;;  %v3679_v63 = vld [vmem:[#allocation8 + $0x108] sm:$0xf] }
  0xc6   :  { %1634 = vmatpush.bf16.msrb.mxu3 %v3236_v4  ;;  %v3444_v4 = vor.u32 %v4194_v55, %v3441_v56  ;;  %v3300_v10 = vor.u32 %v4158_v61, %v3297_v62  ;;  %v3583_v55 = vld [vmem:[#allocation8 + $0x48] sm:$0xf]  ;;  %v4231_v56 = vld [vmem:[#allocation8 + $0x50] sm:$0xf0] }
  0xc7   :  { %1659 = vmatpush.bf16.msrb.mxu0 %v3508_v7  ;;  %v3537_v7 = vld [vmem:[#allocation5 + $0x618] sm:$0xf0]  ;;  %v3584_v1 = vor.u32 %v4231_v56, %v3583_v55  ;;  %v4260_v56 = vld [vmem:[#allocation8 + $0x13c] sm:$0xf] }
  0xc8   :  { %1622 = vmatpush.bf16.msrb.mxu1 %v3092_v14  ;;  %v1357_v14 = vpop.f32.mrf.mxu2 }
  0xc9   :  { %1647 = vmatpush.bf16.msra.mxu2 %v3364_v11  ;;  %v4243_v11 = vld [vmem:[#allocation8 + $0xb0] sm:$0xf0]  ;;  %v3655_v14 = vld [vmem:[#allocation8 + $0xd8] sm:$0xf] }
  0xca   :  { %1635 = vmatpush.bf16.msrb.mxu3 %v3220_v17  ;;  %v3281_v17 = vld [vmem:[#allocation5 + $0x418] sm:$0xf0]  ;;  %v3632_v24 = vor.u32 %v4243_v11, %v3631_v5  ;;  %v4252_v5 = vld [vmem:[#allocation8 + $0xf8] sm:$0xf0] }
  0xcb   :  { %1660 = vmatpush.bf16.msrb.mxu0 %v3492_v20  ;;  %v3540_v20 = vor.u32 %v4218_v6, %v3537_v7  ;;  %v3572_v6 = vor.u32 %v4228_v3, %v3571_v2  ;;  %v4257_v3 = vld [vmem:[#allocation8 + $0x124] sm:$0xf] }
  0xcc   :  { %1623 = vmatpush.bf16.msrb.mxu1 %v3076_v26  ;;  %v3284_v26 = vor.u32 %v4154_v16, %v3281_v17 }
  0xcd   :  { %1648 = vmatpush.bf16.msra.mxu2 %v3348_v57  ;;  %v1370_v57 = vpop.f32.mrf.mxu3 }
  0xce   :  { %1636 = vmatpush.bf16.msrb.mxu3 %v3204_v9  ;;  %v4186_v9 = vld [vmem:[#allocation5 + $0x50c] sm:$0xf]  ;;  %v4242_v57 = vld [vmem:[#allocation8 + $0xac] sm:$0xf] }
  0xcf   :  { %1661 = vmatpush.bf16.msrb.mxu0 %v3476_v31  ;;  %v1330_v31 = vadd.f32 %v4613_v23, %v304_v18  ;;  %v3412_v37 = vor.u32 %v4186_v9, %v3409_v29  ;;  %v3547_v18 = vld [vmem:[#allocation8] sm:$0xf]  ;;  %v4266_v9 = vld [vmem:[#allocation8 + $0x16c] sm:$0xf]  ;;  %v3729_v29 = vld [vmem:[#allocation8 + $0x174] sm:$0xf0] }
  0xd0   :  { %1624 = vmatpush.bf16.msrb.mxu1 %v3060_v41  ;;  %v4237_v41 = vld [vmem:[#allocation8 + $0x80] sm:$0xf0]  ;;  %v1407_v43 = vpop.f32.mrf.mxu2 }
  0xd1   :  { %1649 = vmatpush.bf16.msra.mxu2 %v3332_v36  ;;  %v3620_v36 = vor.u32 %v4240_v28, %v3619_v27  ;;  %v1343_v23 = vadd.f32 %v4615_v32, %v1330_v31  ;;  %v3608_v47 = vor.u32 %v4237_v41, %v3607_v38  ;;  %v4246_v27 = vld [vmem:[#allocation8 + $0xc8] sm:$0xf0]  ;;  %v3621_v38 = vld [vmem:[#allocation8 + $0x9c] sm:$0xf0] }
  0xd2   :  { %1637 = vmatpush.bf16.msrb.mxu3 %v3188_v44  ;;  %v3703_v44 = vld [vmem:[#allocation8 + $0x138] sm:$0xf] }
  0xd3   :  { %1662 = vmatpush.bf16.msrb.mxu0 %v3460_v49  ;;  %v3595_v49 = vld [vmem:[#allocation8 + $0x60] sm:$0xf]  ;;  %v3704_v50 = vor.u32 %v4261_v46, %v3703_v44  ;;  %v1356_v51 = vadd.f32 %v4617_v40, %v1343_v23  ;;  %v305_v44 = vperm.slane %v4621_v58, 1  ;;  %v4263_v46 = vld [vmem:[#allocation8 + $0x154] sm:$0xf] }
  0xd4   :  { %1625 = vmatpush.bf16.msrb.mxu1 %v3044_v59 }
  0xd5   :  { %1650 = vmatpush.bf16.msra.mxu2 %v3316_v54  ;;  %v1369_v62 = vadd.f32 %v4619_v45, %v1356_v51  ;;  %v4285_v51 = vld [vmem:[#allocation8 + $0x200] sm:$0xf0] }
  0xd6   :  { %1638 = vmatpush.bf16.msrb.mxu3 %v3172_v0  ;;  %v4255_v0 = vld [vmem:[#allocation8 + $0x110] sm:$0xf0] }
  0xd7   :  { %1663 = vmatpush.bf16.msrb.mxu0 %v3444_v4  ;;  %v1381_v32 = vpop.f32.mrf.mxu0  ;;  %v3667_v4 = vld [vmem:[#allocation8 + $0xf0] sm:$0xf] }
  0xd8   :  { %1626 = vmatpush.bf16.msrb.mxu1 %v3028_v15  ;;  %v1394_v59 = vpop.f32.mrf.mxu1  ;;  %v1409_v61 = vpop.f32.mrf.mxu2  ;;  %v1382_v40 = vadd.f32 %v1381_v32, %v1369_v62  ;;  %v3668_v12 = vor.u32 %v4252_v5, %v3667_v4  ;;  %v4249_v15 = vld [vmem:[#allocation8 + $0xe0] sm:$0xf0]  ;;  %v4282_v62 = vld [vmem:[#allocation8 + $0x1e8] sm:$0xf0]  ;;  %v3775_v5 = vld [vmem:[#allocation8 + $0x1c8] sm:$0xf] }
  0xd9   :  { %1651 = vmatpush.bf16.msra.mxu2 %v3300_v10  ;;  %v4225_v10 = vld [vmem:[#allocation8 + $0x20] sm:$0xf0]  ;;  %v3787_v61 = vld [vmem:[#allocation8 + $0x1e0] sm:$0xf] }
  0xda   :  { %1639 = vmatpush.bf16.msrb.mxu3 %v3156_v19  ;;  %v1395_v7 = vadd.f32 %v1394_v59, %v1382_v40  ;;  %v3560_v17 = vor.u32 %v4225_v10, %v3559_v8  ;;  %v3705_v59 = vld [vmem:[#allocation8 + $0x144] sm:$0xf0]  ;;  %v3585_v8 = vld [vmem:[#allocation8 + $0x54] sm:$0xf0] }
  0xdb   :  { %1664 = vmatpush.bf16.msrb.mxu0 %v3428_v25  ;;  %1627 = vmatmul.bf16.vlgmr.msrb.gmra.mxu1 %v4573_v53  ;;  %v4234_v53 = vld [vmem:[#allocation8 + $0x68] sm:$0xf0]  ;;  %v3824_v25 = vor.u32 %v4291_v22, %v3823_v21  ;;  %v3708_v40 = vor.u32 %v4260_v56, %v3705_v59  ;;  %v3645_v56 = vld [vmem:[#allocation8 + $0xcc] sm:$0xf0] }
  0xdc   :  { %1678 = vmatpush.bf16.msra.mxu1 %v3540_v20  ;;  %v3596_v54 = vor.u32 %v4234_v53, %v3595_v49  ;;  %v1408_v19 = vadd.f32 %v1407_v43, %v1395_v7  ;;  %v4222_v20 = vld [vmem:[#allocation8 + $0x8] sm:$0xf0]  ;;  %v3732_v43 = vor.u32 %v4266_v9, %v3729_v29  ;;  %v3561_v9 = vld [vmem:[#allocation8 + $0x24] sm:$0xf0] }
  0xdd   :  { %1652 = vmatpush.bf16.msra.mxu2 %v3284_v26  ;;  %1640 = vmatmul.bf16.vlgmr.msrb.gmra.mxu3 %v4577_v60  ;;  %v4258_v60 = vld [vmem:[#allocation8 + $0x128] sm:$0xf0]  ;;  %v3643_v26 = vld [vmem:[#allocation8 + $0xc0] sm:$0xf]  ;;  %v3548_v28 = vor.u32 %v4222_v20, %v3547_v18  ;;  %v4227_v18 = vld [vmem:[#allocation8 + $0x34] sm:$0xf] }
  0xde   :  { %2340 = vmatpush.bf16.msra.mxu3 %v3632_v24  ;;  %v3656_v24 = vor.u32 %v4249_v15, %v3655_v14  ;;  %v3644_v41 = vor.u32 %v4246_v27, %v3643_v26  ;;  %v4230_v7 = vld [vmem:[#allocation8 + $0x4c] sm:$0xf]  ;;  %v3681_v14 = vld [vmem:[#allocation8 + $0x114] sm:$0xf0]  ;;  %v4273_v27 = vld [vmem:[#allocation8 + $0x1a0] sm:$0xf0] }
  0xdf   :  { %1665 = vmatpush.bf16.msrb.mxu0 %v3412_v37  ;;  %v1383_v45 = vpop.f32.mrf.mxu0  ;;  %v4239_v37 = vld [vmem:[#allocation8 + $0x94] sm:$0xf]  ;;  %v3588_v15 = vor.u32 %v4230_v7, %v3585_v8  ;;  %v3751_v26 = vld [vmem:[#allocation8 + $0x198] sm:$0xf]  ;;  %v3615_v7 = vld [vmem:[#allocation8 + $0x80] sm:$0xf] }
  0xe0   :  { %2353 = vmatpush.bf16.msrb.mxu1 %v3728_v30  ;;  %1653 = vmatmul.bf16.vlgmr.msra.gmra.mxu2 %v4589_v34  ;;  %v3692_v34 = vor.u32 %v4258_v60, %v3691_v52  ;;  %v1420_v11 = vpop.f32.mrf.mxu3  ;;  %v1396_v13 = vpop.f32.mrf.mxu1  ;;  %v1684_v30 = vmax.f32 %v1408_v19, 0.0  ;;  %v3624_v53 = vor.u32 %v4239_v37, %v3621_v38  ;;  %v4236_v52 = vld [vmem:[#allocation8 + $0x7c] sm:$0xf]  ;;  %v3609_v60 = vld [vmem:[#allocation8 + $0x84] sm:$0xf0]  ;;  %v3752_v29 = vor.u32 %v4273_v27, %v3751_v26 }
  0xe1   :  { %2366 = vmatpush.bf16.msrb.mxu2 %v3824_v25  ;;  %v1421_v55 = vadd.f32 %v1420_v11, %v305_v44  ;;  %v4254_v13 = vld [vmem:[#allocation8 + $0x10c] sm:$0xf]  ;;  %v3573_v19 = vld [vmem:[#allocation8 + $0x3c] sm:$0xf0]  ;;  %v4248_v37 = vld [vmem:[#allocation8 + $0xdc] sm:$0xf] }
  0xe2   :  { %2341 = vmatpush.bf16.msra.mxu3 %v3620_v36  ;;  %1666 = vmatmul.bf16.vlgmr.msrb.gmra.mxu0 %v4591_v39  ;;  %v3680_v39 = vor.u32 %v4255_v0, %v3679_v63  ;;  %v4288_v36 = vld [vmem:[#allocation8 + $0x218] sm:$0xf0]  ;;  %v4635_v49 = vpack.c.bf16 %v1684_v30, %v1684_v30  ;;  %v4233_v63 = vld [vmem:[#allocation8 + $0x64] sm:$0xf]  ;;  %v3597_v0 = vld [vmem:[#allocation8 + $0x6c] sm:$0xf0]  ;;  %v3684_v22 = vor.u32 %v4254_v13, %v3681_v14 }
  0xe3   :  { %v1433_v16 = vpop.f32.mrf.mxu2  ;;  %v3600_v4 = vor.u32 %v4233_v63, %v3597_v0  ;;  %v3576_v25 = vor.u32 %v4227_v18, %v3573_v19  ;;  %v3657_v38 = vld [vmem:[#allocation8 + $0xe4] sm:$0xf0]  ;;  %v3549_v44 = vld [vmem:[#allocation8 + $0xc] sm:$0xf0]  ;;  %v3627_v0 = vld [vmem:[#allocation8 + $0x98] sm:$0xf] }
  0xe4   :  { %2354 = vmatpush.bf16.msrb.mxu1 %v3716_v42  ;;  %v3812_v42 = vor.u32 %v4288_v36, %v3811_v35  ;;  %v1434_v2 = vadd.f32 %v1433_v16, %v1421_v55  ;;  %v3763_v16 = vld [vmem:[#allocation8 + $0x1b0] sm:$0xf]  ;;  %v4245_v55 = vld [vmem:[#allocation8 + $0xc4] sm:$0xf]  ;;  %v4238_v13 = vld [vmem:[#allocation8 + $0x88] sm:$0xf0] }
  0xe5   :  { %v3723_v18 = vld [vmem:[#allocation8 + $0x158] sm:$0xf]  ;;  %v4265_v19 = vld [vmem:[#allocation8 + $0x160] sm:$0xf0]  ;;  %v3603_v26 = vld [vmem:[#allocation8 + $0x68] sm:$0xf] }
  0xe6   :  { %2342 = vmatpush.bf16.msra.mxu3 %v3608_v47  ;;  %v3717_v47 = vld [vmem:[#allocation8 + $0x15c] sm:$0xf0]  ;;  %2367 = vmatpush.bf16.msrb.mxu2 %v3812_v42  ;;  %v4221_v42 = vld [vmem:[#allocation8 + $0x4] sm:$0xf]  ;;  %v4235_v27 = vld [vmem:[#allocation8 + $0x70] sm:$0xf0] }
  0xe7   :  { %v3720_v32 = vor.u32 %v4263_v46, %v3717_v47  ;;  %v4290_v47 = vld [vmem:[#allocation8 + $0x22c] sm:$0xf]  ;;  %v3552_v59 = vor.u32 %v4221_v42, %v3549_v44  ;;  %v4232_v42 = vld [vmem:[#allocation8 + $0x58] sm:$0xf0]  ;;  %v3699_v44 = vld [vmem:[#allocation8 + $0x128] sm:$0xf] }
  0xe8   :  { %2355 = vmatpush.bf16.msrb.mxu1 %v3704_v50  ;;  %v1422_v33 = vpop.f32.mrf.mxu3  ;;  %v3799_v50 = vld [vmem:[#allocation8 + $0x1f8] sm:$0xf] }
  0xea   :  { %2343 = vmatpush.bf16.msra.mxu3 %v3596_v54  ;;  %v3800_v54 = vor.u32 %v4285_v51, %v3799_v50  ;;  %v3639_v50 = vld [vmem:[#allocation8 + $0xb0] sm:$0xf]  ;;  %v4244_v51 = vld [vmem:[#allocation8 + $0xb8] sm:$0xf0] }
  0xeb   :  { %3544 = vmatmul.msk.bf16.vlgmr.msra.gmra.mxu1 %vm1316_vm0, %v4585_v48  ;;  %v3633_v48 = vld [vmem:[#allocation8 + $0xb4] sm:$0xf0]  ;;  %v1435_v23 = vpop.f32.mrf.mxu2 }
  0xec   :  { %2356 = vmatpush.bf16.msrb.mxu1 %v3692_v34  ;;  %v3636_v31 = vor.u32 %v4242_v57, %v3633_v48  ;;  %2368 = vmatpush.bf16.msrb.mxu2 %v3800_v54  ;;  %v3612_v34 = vor.u32 %v4236_v52, %v3609_v60  ;;  %v4251_v48 = vld [vmem:[#allocation8 + $0xf4] sm:$0xf]  ;;  %v4270_v23 = vld [vmem:[#allocation8 + $0x188] sm:$0xf0]  ;;  %v3660_v52 = vor.u32 %v4248_v37, %v3657_v38 }
  0xed   :  { %v4278_v37 = vld [vmem:[#allocation8 + $0x1cc] sm:$0xf] }
  0xee   :  { %2344 = vmatpush.bf16.msra.mxu3 %v3584_v1  ;;  %v3788_v1 = vor.u32 %v4282_v62, %v3787_v61  ;;  %v4287_v61 = vld [vmem:[#allocation8 + $0x214] sm:$0xf]  ;;  %v3813_v62 = vld [vmem:[#allocation8 + $0x21c] sm:$0xf0] }
  0xf0   :  { %2357 = vmatpush.bf16.msrb.mxu1 %v3680_v39  ;;  %v3693_v39 = vld [vmem:[#allocation8 + $0x12c] sm:$0xf0]  ;;  %2369 = vmatpush.bf16.msrb.mxu2 %v3788_v1  ;;  %v4241_v1 = vld [vmem:[#allocation8 + $0xa0] sm:$0xf0] }
  0xf1   :  { %v3696_v11 = vor.u32 %v4257_v3, %v3693_v39  ;;  %v3816_v3 = vor.u32 %v4287_v61, %v3813_v62  ;;  %v3687_v61 = vld [vmem:[#allocation8 + $0x110] sm:$0xf]  ;;  %v4256_v62 = vld [vmem:[#allocation8 + $0x118] sm:$0xf0] }
  0xf2   :  { %2345 = vmatpush.bf16.msra.mxu3 %v3572_v6  ;;  %v4279_v6 = vld [vmem:[#allocation8 + $0x1d0] sm:$0xf0] }
  0xf3   :  { %v3776_v10 = vor.u32 %v4279_v6, %v3775_v5  ;;  %v4268_v5 = vld [vmem:[#allocation8 + $0x178] sm:$0xf0] }
  0xf4   :  { %2358 = vmatpush.bf16.msrb.mxu1 %v3668_v12 }
  0xf5   :  { %2370 = vmatpush.bf16.msrb.mxu2 %v3776_v10  ;;  %v3628_v10 = vor.u32 %v4241_v1, %v3627_v0  ;;  %v3871_v1 = vld [vmem:[#allocation8 + $0x288] sm:$0xf] }
  0xf6   :  { %2346 = vmatpush.bf16.msra.mxu3 %v3560_v17  ;;  %v4276_v17 = vld [vmem:[#allocation8 + $0x1b8] sm:$0xf0] }
  0xf7   :  { %v1446_v45 = vpop.f32.mrf.mxu0  ;;  %v3764_v20 = vor.u32 %v4276_v17, %v3763_v16  ;;  %v3801_v16 = vld [vmem:[#allocation8 + $0x204] sm:$0xf0] }
  0xf8   :  { %2359 = vmatpush.bf16.msrb.mxu1 %v3656_v24  ;;  %v1447_v12 = vadd.f32 %v1446_v45, %v1434_v2  ;;  %v1459_v21 = vpop.f32.mrf.mxu1  ;;  %v3669_v24 = vld [vmem:[#allocation8 + $0xfc] sm:$0xf0]  ;;  %v3919_v45 = vld [vmem:[#allocation8 + $0x2e8] sm:$0xf] }
  0xf9   :  { %2371 = vmatpush.bf16.msrb.mxu2 %v3764_v20  ;;  %v3672_v33 = vor.u32 %v4251_v48, %v3669_v24  ;;  %v4281_v48 = vld [vmem:[#allocation8 + $0x1e4] sm:$0xf] }
  0xfa   :  { %2347 = vmatpush.bf16.msra.mxu3 %v3548_v28  ;;  %v1460_v57 = vadd.f32 %v1459_v21, %v1447_v12  ;;  %v4224_v28 = vld [vmem:[#allocation8 + $0x1c] sm:$0xf]  ;;  %v3616_v21 = vor.u32 %v4238_v13, %v3615_v7 }
  0xfb   :  { %v4300_v13 = vld [vmem:[#allocation8 + $0x278] sm:$0xf0] }
  0xfc   :  { %2360 = vmatpush.bf16.msrb.mxu1 %v3644_v41  ;;  %v3564_v41 = vor.u32 %v4224_v28, %v3561_v9  ;;  %v3789_v9 = vld [vmem:[#allocation8 + $0x1ec] sm:$0xf0] }
  0xfd   :  { %2348 = vmatmul.bf16.vlgmr.msra.gmra.mxu3 %v4635_v49  ;;  %2372 = vmatpush.bf16.msrb.mxu2 %v3752_v29  ;;  %v3711_v29 = vld [vmem:[#allocation8 + $0x140] sm:$0xf] }
  0xfe   :  { %2392 = vmatpush.bf16.msrb.mxu3 %v3636_v31 }
  0xff   :  { %v1448_v30 = vpop.f32.mrf.mxu0 }
 0x100   :  { %2405 = vmatpush.bf16.msra.mxu1 %v3732_v43  ;;  %v1472_v31 = vpop.f32.mrf.mxu3  ;;  %v3739_v43 = vld [vmem:[#allocation8 + $0x180] sm:$0xf]  ;;  %v1461_v60 = vpop.f32.mrf.mxu1  ;;  %v4262_v30 = vld [vmem:[#allocation8 + $0x148] sm:$0xf0] }
 0x101   :  { %v1473_v35 = vadd.f32 %v1472_v31, %v1460_v57  ;;  %v3740_v46 = vor.u32 %v4270_v23, %v3739_v43  ;;  %v4312_v57 = vld [vmem:[#allocation8 + $0x2d8] sm:$0xf0]  ;;  %v3792_v31 = vor.u32 %v4281_v48, %v3789_v9  ;;  %v3712_v38 = vor.u32 %v4262_v30, %v3711_v29  ;;  %v3777_v23 = vld [vmem:[#allocation8 + $0x1d4] sm:$0xf0]  ;;  %v4250_v48 = vld [vmem:[#allocation8 + $0xe8] sm:$0xf0] }
 0x102   :  { %2393 = vmatpush.bf16.msrb.mxu3 %v3624_v53  ;;  %v3825_v53 = vld [vmem:[#allocation8 + $0x234] sm:$0xf0]  ;;  %v3651_v30 = vld [vmem:[#allocation8 + $0xc8] sm:$0xf] }
 0x103   :  { %v1485_v36 = vpop.f32.mrf.mxu2  ;;  %v3828_v54 = vor.u32 %v4290_v47, %v3825_v53  ;;  %2373 = vmatpush.bf16.msrb.mxu2 %v3740_v46  ;;  %v4259_v46 = vld [vmem:[#allocation8 + $0x130] sm:$0xf0]  ;;  %v3780_v47 = vor.u32 %v4278_v37, %v3777_v23  ;;  %v4294_v37 = vld [vmem:[#allocation8 + $0x248] sm:$0xf0]  ;;  %v3921_v23 = vld [vmem:[#allocation8 + $0x2f4] sm:$0xf0] }
 0x104   :  { %2406 = vmatpush.bf16.msra.mxu1 %v3720_v32  ;;  %v1486_v32 = vadd.f32 %v1485_v36, %v1473_v35  ;;  %v3895_v35 = vld [vmem:[#allocation8 + $0x2b8] sm:$0xf]  ;;  %v4309_v36 = vld [vmem:[#allocation8 + $0x2c0] sm:$0xf0] }
 0x105   :  { %v3896_v43 = vor.u32 %v4309_v36, %v3895_v35  ;;  %v306_v35 = vperm.slane %v4621_v58, 2  ;;  %v3835_v36 = vld [vmem:[#allocation8 + $0x240] sm:$0xf] }
 0x106   :  { %2394 = vmatpush.bf16.msrb.mxu3 %v3612_v34  ;;  %v3640_v34 = vor.u32 %v4244_v51, %v3639_v50  ;;  %v3883_v50 = vld [vmem:[#allocation8 + $0x2a0] sm:$0xf]  ;;  %v4306_v51 = vld [vmem:[#allocation8 + $0x2a8] sm:$0xf0] }
 0x107   :  { %2418 = vmatpush.bf16.msra.mxu2 %v3828_v54  ;;  %v1498_v63 = vpop.f32.mrf.mxu0  ;;  %v3700_v54 = vor.u32 %v4259_v46, %v3699_v44 }
 0x108   :  { %2407 = vmatpush.bf16.msra.mxu1 %v3708_v40  ;;  %v3648_v40 = vor.u32 %v4245_v55, %v3645_v56  ;;  %v1474_v2 = vpop.f32.mrf.mxu3  ;;  %v1499_v39 = vadd.f32 %v1498_v63, %v1486_v32  ;;  %v3579_v32 = vld [vmem:[#allocation8 + $0x38] sm:$0xf]  ;;  %v4229_v55 = vld [vmem:[#allocation8 + $0x40] sm:$0xf0]  ;;  %v3884_v56 = vor.u32 %v4306_v51, %v3883_v50  ;;  %v3909_v50 = vld [vmem:[#allocation8 + $0x2dc] sm:$0xf0] }
 0x109   :  { %v3580_v0 = vor.u32 %v4229_v55, %v3579_v32  ;;  %v4272_v2 = vld [vmem:[#allocation8 + $0x19c] sm:$0xf]  ;;  %v3897_v55 = vld [vmem:[#allocation8 + $0x2c4] sm:$0xf0] }
 0x10a   :  { %2395 = vmatpush.bf16.msrb.mxu3 %v3600_v4  ;;  %v3735_v4 = vld [vmem:[#allocation8 + $0x170] sm:$0xf]  ;;  %v1685_v8 = vmax.f32 %v1499_v39, 0.0  ;;  %v3567_v39 = vld [vmem:[#allocation8 + $0x20] sm:$0xf] }
 0x10b   :  { %v1487_v6 = vpop.f32.mrf.mxu2  ;;  %2419 = vmatpush.bf16.msra.mxu2 %v3816_v3  ;;  %v3736_v12 = vor.u32 %v4268_v5, %v3735_v4  ;;  %v3688_v3 = vor.u32 %v4256_v62, %v3687_v61  ;;  %v4226_v4 = vld [vmem:[#allocation8 + $0x28] sm:$0xf0]  ;;  %v4308_v32 = vld [vmem:[#allocation8 + $0x2bc] sm:$0xf] }
 0x10c   :  { %2408 = vmatpush.bf16.msra.mxu1 %v3696_v11  ;;  %v4315_v11 = vld [vmem:[#allocation8 + $0x2f0] sm:$0xf0]  ;;  %v4638_v17 = vpack.c.bf16 %v1685_v8, %v1685_v8  ;;  %v3753_v6 = vld [vmem:[#allocation8 + $0x1a4] sm:$0xf0]  ;;  %v3675_v8 = vld [vmem:[#allocation8 + $0xf8] sm:$0xf] }
 0x10d   :  { %v3920_v14 = vor.u32 %v4315_v11, %v3919_v45  ;;  %v3756_v45 = vor.u32 %v4272_v2, %v3753_v6  ;;  %v3568_v11 = vor.u32 %v4226_v4, %v3567_v39  ;;  %v3873_v2 = vld [vmem:[#allocation8 + $0x294] sm:$0xf0] }
 0x10e   :  { %2396 = vmatpush.bf16.msrb.mxu3 %v3588_v15  ;;  %v4284_v15 = vld [vmem:[#allocation8 + $0x1fc] sm:$0xf]  ;;  %2361 = vmatmul.bf16.vlgmr.msrb.gmra.mxu1 %v4638_v17 }
 0x10f   :  { %v3804_v20 = vor.u32 %v4284_v15, %v3801_v16  ;;  %2379 = vmatpush.bf16.msra.mxu0 %v3920_v14  ;;  %v1500_v24 = vpop.f32.mrf.mxu0  ;;  %v4269_v14 = vld [vmem:[#allocation8 + $0x184] sm:$0xf] }
 0x110   :  { %2409 = vmatpush.bf16.msra.mxu1 %v3684_v22  ;;  %v3907_v22 = vld [vmem:[#allocation8 + $0x2d0] sm:$0xf] }
 0x111   :  { %2420 = vmatpush.bf16.msra.mxu2 %v3804_v20  ;;  %v3908_v28 = vor.u32 %v4312_v57, %v3907_v22  ;;  %v3663_v57 = vld [vmem:[#allocation8 + $0xe0] sm:$0xf] }
 0x112   :  { %2397 = vmatpush.bf16.msrb.mxu3 %v3576_v25  ;;  %v3724_v25 = vor.u32 %v4265_v19, %v3723_v18  ;;  %v3555_v18 = vld [vmem:[#allocation8 + $0x8] sm:$0xf]  ;;  %v4223_v19 = vld [vmem:[#allocation8 + $0x10] sm:$0xf0]  ;;  %v3664_v9 = vor.u32 %v4250_v48, %v3663_v57  ;;  %v3807_v57 = vld [vmem:[#allocation8 + $0x200] sm:$0xf] }
 0x113   :  { %2380 = vmatpush.bf16.msra.mxu0 %v3908_v28  ;;  %v4297_v28 = vld [vmem:[#allocation8 + $0x260] sm:$0xf0]  ;;  %v4286_v48 = vld [vmem:[#allocation8 + $0x208] sm:$0xf0] }
 0x114   :  { %2410 = vmatpush.bf16.msra.mxu1 %v3672_v33  ;;  %v3604_v33 = vor.u32 %v4235_v27, %v3603_v26  ;;  %v3556_v26 = vor.u32 %v4223_v19, %v3555_v18  ;;  %v3847_v27 = vld [vmem:[#allocation8 + $0x258] sm:$0xf]  ;;  %v4296_v18 = vld [vmem:[#allocation8 + $0x25c] sm:$0xf]  ;;  %v3849_v19 = vld [vmem:[#allocation8 + $0x264] sm:$0xf0] }
 0x115   :  { %2421 = vmatpush.bf16.msra.mxu2 %v3792_v31  ;;  %v3848_v29 = vor.u32 %v4297_v28, %v3847_v27  ;;  %v4247_v31 = vld [vmem:[#allocation8 + $0xd0] sm:$0xf0]  ;;  %v3808_v28 = vor.u32 %v4286_v48, %v3807_v57  ;;  %v3843_v48 = vld [vmem:[#allocation8 + $0x248] sm:$0xf] }
 0x116   :  { %2398 = vmatpush.bf16.msrb.mxu3 %v3564_v41  ;;  %v3591_v41 = vld [vmem:[#allocation8 + $0x50] sm:$0xf] }
 0x117   :  { %2381 = vmatpush.bf16.msra.mxu0 %v3896_v43  ;;  %v3592_v53 = vor.u32 %v4232_v42, %v3591_v41  ;;  %v3652_v41 = vor.u32 %v4247_v31, %v3651_v30  ;;  %v3836_v43 = vor.u32 %v4294_v37, %v3835_v36  ;;  %v307_v30 = vperm.slane %v4621_v58, 3 }
 0x118   :  { %2411 = vmatpush.bf16.msra.mxu1 %v3660_v52  ;;  %v4275_v52 = vld [vmem:[#allocation8 + $0x1b4] sm:$0xf] }
 0x119   :  { %2422 = vmatpush.bf16.msra.mxu2 %v3780_v47 }
 0x11a   :  { %2399 = vmatpush.bf16.msrb.mxu3 %v3552_v59  ;;  %v3765_v59 = vld [vmem:[#allocation8 + $0x1bc] sm:$0xf0] }
 0x11b   :  { %v4642_v60 = vpop.f32.mrf.mxu0  ;;  %v3768_v63 = vor.u32 %v4275_v52, %v3765_v59  ;;  %2382 = vmatpush.bf16.msra.mxu0 %v3884_v56  ;;  %v3900_v56 = vor.u32 %v4308_v32, %v3897_v55  ;;  %v3747_v32 = vld [vmem:[#allocation8 + $0x188] sm:$0xf]  ;;  %v4271_v55 = vld [vmem:[#allocation8 + $0x190] sm:$0xf0] }
 0x11c   :  { %2412 = vmatpush.bf16.msra.mxu1 %v3648_v40  ;;  %v4303_v40 = vld [vmem:[#allocation8 + $0x290] sm:$0xf0] }
 0x11d   :  { %2400 = vmatmul.bf16.vlgmr.msrb.gmra.mxu3 %v4635_v49  ;;  %2423 = vmatpush.bf16.msra.mxu2 %v3768_v63  ;;  %v3872_v5 = vor.u32 %v4303_v40, %v3871_v1  ;;  %v4302_v40 = vld [vmem:[#allocation8 + $0x28c] sm:$0xf] }
 0x11e   :  { %2444 = vmatpush.bf16.msra.mxu3 %v3640_v34  ;;  %v4644_v34 = vpop.f32.mrf.mxu1 }
 0x11f   :  { %2383 = vmatpush.bf16.msra.mxu0 %v3872_v5  ;;  %2413 = vmatmul.bf16.vlgmr.msra.gmra.mxu1 %v4638_v17  ;;  %v1512_v47 = vadd.f32 %v4644_v34, %v306_v35  ;;  %v4305_v34 = vld [vmem:[#allocation8 + $0x2a4] sm:$0xf]  ;;  %v3831_v5 = vld [vmem:[#allocation8 + $0x230] sm:$0xf]  ;;  %v4280_v35 = vld [vmem:[#allocation8 + $0x1d8] sm:$0xf0] }
 0x120   :  { %2457 = vmatpush.bf16.msrb.mxu1 %v3736_v12  ;;  %v1524_v7 = vpop.f32.mrf.mxu3  ;;  %v3859_v12 = vld [vmem:[#allocation8 + $0x270] sm:$0xf] }
 0x121   :  { %2424 = vmatpush.bf16.msra.mxu2 %v3756_v45  ;;  %v3860_v20 = vor.u32 %v4300_v13, %v3859_v12  ;;  %v1525_v52 = vadd.f32 %v1524_v7, %v1512_v47  ;;  %v4292_v7 = vld [vmem:[#allocation8 + $0x238] sm:$0xf0]  ;;  %v3819_v13 = vld [vmem:[#allocation8 + $0x218] sm:$0xf] }
 0x122   :  { %2445 = vmatpush.bf16.msra.mxu3 %v3628_v10  ;;  %v4253_v10 = vld [vmem:[#allocation8 + $0x100] sm:$0xf0]  ;;  %v3832_v12 = vor.u32 %v4292_v7, %v3831_v5  ;;  %v3903_v7 = vld [vmem:[#allocation8 + $0x2c0] sm:$0xf] }
 0x123   :  { %v1539_v15 = vpop.f32.mrf.mxu0  ;;  %v3676_v16 = vor.u32 %v4253_v10, %v3675_v8  ;;  %v1550_v22 = vpop.f32.mrf.mxu2  ;;  %2384 = vmatpush.bf16.msra.mxu0 %v3860_v20  ;;  %v1538_v59 = vadd.f32 %v4642_v60, %v1525_v52  ;;  %v4299_v8 = vld [vmem:[#allocation8 + $0x274] sm:$0xf]  ;;  %v3861_v10 = vld [vmem:[#allocation8 + $0x27c] sm:$0xf0] }
 0x124   :  { %2458 = vmatpush.bf16.msrb.mxu1 %v3724_v25  ;;  %v3864_v45 = vor.u32 %v4299_v8, %v3861_v10  ;;  %v4289_v15 = vld [vmem:[#allocation8 + $0x220] sm:$0xf0]  ;;  %v3891_v10 = vld [vmem:[#allocation8 + $0x2a8] sm:$0xf] }
 0x125   :  { %v1551_v63 = vadd.f32 %v1550_v22, %v1538_v59  ;;  %v3820_v22 = vor.u32 %v4289_v15, %v3819_v13  ;;  %v3748_v59 = vor.u32 %v4271_v55, %v3747_v32  ;;  %v4304_v13 = vld [vmem:[#allocation8 + $0x298] sm:$0xf0]  ;;  %v4319_v55 = vld [vmem:[#allocation10 + $0x10] sm:$0xff] }
 0x126   :  { %2446 = vmatpush.bf16.msra.mxu3 %v3616_v21  ;;  %v3741_v21 = vld [vmem:[#allocation8 + $0x18c] sm:$0xf0]  ;;  %v1513_v24 = vpop.f32.mrf.mxu1  ;;  %v4320_v32 = vld [vmem:[#allocation10 + $0x18] sm:$0xff] }
 0x127   :  { %v3744_v25 = vor.u32 %v4269_v14, %v3741_v21  ;;  %2385 = vmatpush.bf16.msra.mxu0 %v3848_v29  ;;  %v3852_v21 = vor.u32 %v4296_v18, %v3849_v19  ;;  %v4283_v29 = vld [vmem:[#allocation8 + $0x1f0] sm:$0xf0]  ;;  %v4301_v18 = vld [vmem:[#allocation8 + $0x280] sm:$0xf0] }
 0x128   :  { %2459 = vmatpush.bf16.msrb.mxu1 %v3712_v38  ;;  %v4314_v38 = vld [vmem:[#allocation8 + $0x2ec] sm:$0xf] }
 0x129   :  { %2425 = vmatpush.bf16.msra.mxu2 %v3744_v25  ;;  %v3924_v46 = vor.u32 %v4314_v38, %v3921_v23  ;;  %v4293_v25 = vld [vmem:[#allocation8 + $0x244] sm:$0xf] }
 0x12a   :  { %2447 = vmatpush.bf16.msra.mxu3 %v3604_v33  ;;  %v1526_v33 = vpop.f32.mrf.mxu3 }
 0x12b   :  { %v1589_v42 = vpop.f32.mrf.mxu0  ;;  %v1552_v44 = vpop.f32.mrf.mxu2  ;;  %2386 = vmatpush.bf16.msra.mxu0 %v3836_v43  ;;  %v3783_v33 = vld [vmem:[#allocation8 + $0x1d0] sm:$0xf] }
 0x12c   :  { %2460 = vmatpush.bf16.msrb.mxu1 %v3700_v54  ;;  %v3784_v38 = vor.u32 %v4280_v35, %v3783_v33  ;;  %v3759_v44 = vld [vmem:[#allocation8 + $0x1a0] sm:$0xf] }
 0x12e   :  { %2448 = vmatpush.bf16.msra.mxu3 %v3592_v53  ;;  %v4311_v53 = vld [vmem:[#allocation8 + $0x2d4] sm:$0xf] }
 0x12f   :  { %2431 = vmatpush.bf16.msrb.mxu0 %v3924_v46  ;;  %v3912_v51 = vor.u32 %v4311_v53, %v3909_v50  ;;  %v4274_v46 = vld [vmem:[#allocation8 + $0x1a8] sm:$0xf0] }
 0x130   :  { %2461 = vmatpush.bf16.msrb.mxu1 %v3688_v3  ;;  %v3760_v52 = vor.u32 %v4274_v46, %v3759_v44  ;;  %v4323_v46 = vld [vmem:[#allocation10 + $0x30] sm:$0xff] }
 0x132   :  { %2449 = vmatpush.bf16.msra.mxu3 %v3580_v0 }
 0x133   :  { %2432 = vmatpush.bf16.msrb.mxu0 %v3912_v51  ;;  %v1591_v54 = vpop.f32.mrf.mxu0 }
 0x134   :  { %2462 = vmatpush.bf16.msrb.mxu1 %v3676_v16 }
 0x136   :  { %2450 = vmatpush.bf16.msra.mxu3 %v3568_v11 }
 0x137   :  { %2433 = vmatpush.bf16.msrb.mxu0 %v3900_v56 }
 0x138   :  { %2463 = vmatpush.bf16.msrb.mxu1 %v3664_v9  ;;  %v1563_v61 = vpop.f32.mrf.mxu1  ;;  %v3795_v9 = vld [vmem:[#allocation8 + $0x1e8] sm:$0xf] }
 0x139   :  { %v1564_v0 = vadd.f32 %v1563_v61, %v1551_v63  ;;  %v3796_v31 = vor.u32 %v4283_v29, %v3795_v9 }
 0x13a   :  { %2451 = vmatpush.bf16.msra.mxu3 %v3556_v26  ;;  %v3837_v26 = vld [vmem:[#allocation8 + $0x24c] sm:$0xf0] }
 0x13b   :  { %v3840_v27 = vor.u32 %v4293_v25, %v3837_v26  ;;  %v1820_v26 = vld [vmem:[%s4675_s4] sm:$0x7] }
 0x13c   :  { %2464 = vmatpush.bf16.msrb.mxu1 %v3652_v41  ;;  %v3771_v41 = vld [vmem:[#allocation8 + $0x1b8] sm:$0xf]  ;;  %v1823_v33 = vperm.slane %v1820_v26, 1 }
 0x13d   :  { %2452 = vmatmul.bf16.vlgmr.msra.gmra.mxu3 %v4635_v49  ;;  %v3885_v49 = vld [vmem:[#allocation8 + $0x2ac] sm:$0xf0] }
 0x13e   :  { %v3888_v62 = vor.u32 %v4305_v34, %v3885_v49 }
 0x13f   :  { %2465 = vmatmul.bf16.vlgmr.msrb.gmra.mxu1 %v4638_v17  ;;  %v1615_v1 = vpop.f32.mrf.mxu0  ;;  %v3876_v17 = vor.u32 %v4302_v40, %v3873_v2  ;;  %v4316_v40 = vld [vmem:[#allocation8 + $0x2f8] sm:$0xf0] }
 0x140   :  { %2434 = vmatpush.bf16.msrb.mxu0 %v3888_v62  ;;  %v1576_v3 = vpop.f32.mrf.mxu3  ;;  %v1565_v4 = vpop.f32.mrf.mxu1 }
 0x141   :  { %v1577_v39 = vadd.f32 %v1576_v3, %v1564_v0  ;;  %v4313_v4 = vld [vmem:[#allocation8 + $0x2e0] sm:$0xf0] }
 0x143   :  { %v1590_v6 = vadd.f32 %v1589_v42, %v1577_v39  ;;  %v1602_v60 = vpop.f32.mrf.mxu2  ;;  %v4277_v42 = vld [vmem:[#allocation8 + $0x1c0] sm:$0xf0]  ;;  %v3915_v39 = vld [vmem:[#allocation8 + $0x2d8] sm:$0xf] }
 0x144   :  { %2435 = vmatpush.bf16.msrb.mxu0 %v3876_v17  ;;  %v1603_v36 = vadd.f32 %v1602_v60, %v307_v30  ;;  %v3772_v23 = vor.u32 %v4277_v42, %v3771_v41  ;;  %v4310_v60 = vld [vmem:[#allocation8 + $0x2c8] sm:$0xf0]  ;;  %v4324_v42 = vld [vmem:[#allocation10 + $0x38] sm:$0xff] }
 0x145   :  { %v1686_v11 = vmax.f32 %v1590_v6, 0.0  ;;  %v3916_v6 = vor.u32 %v4313_v4, %v3915_v39  ;;  %v3904_v8 = vor.u32 %v4310_v60, %v3903_v7  ;;  %2698 = vmatpush.bf16.msrb.mxu3 %v4324_v42  ;;  %v4325_v4 = vld [vmem:[#allocation10 + $0x40] sm:$0xff]  ;;  %v4335_v7 = vld [vmem:[#allocation10 + $0x90] sm:$0xff] }
 0x146   :  { %v1616_v43 = vadd.f32 %v1615_v1, %v1603_v36  ;;  %v3927_v1 = vld [vmem:[#allocation8 + $0x2f0] sm:$0xf] }
 0x147   :  { %v1690_v14 = vpack.c.bf16 %v1686_v11, %v1686_v11  ;;  %v1617_v16 = vpop.f32.mrf.mxu0  ;;  %v3928_v3 = vor.u32 %v4316_v40, %v3927_v1  ;;  %v4327_v40 = vld [vmem:[#allocation10 + $0x50] sm:$0xff] }
 0x148   :  { %2436 = vmatpush.bf16.msrb.mxu0 %v3864_v45  ;;  %v1578_v20 = vpop.f32.mrf.mxu3  ;;  %v4307_v45 = vld [vmem:[#allocation8 + $0x2b0] sm:$0xf0]  ;;  %v3867_v16 = vld [vmem:[#allocation8 + $0x278] sm:$0xf] }
 0x149   :  { %2374 = vmatmul.bf16.vlgmr.msrb.gmra.mxu2 %v1690_v14  ;;  %v3892_v11 = vor.u32 %v4307_v45, %v3891_v10  ;;  %v3868_v19 = vor.u32 %v4301_v18, %v3867_v16  ;;  %v3855_v20 = vld [vmem:[#allocation8 + $0x260] sm:$0xf]  ;;  %2699 = vmatpush.bf16.msrb.mxu3 %v4323_v46  ;;  %v4334_v10 = vld [vmem:[#allocation10 + $0x88] sm:$0xff] }
 0x14a   :  { %2470 = vmatpush.bf16.msrb.mxu2 %v3832_v12  ;;  %v3879_v12 = vld [vmem:[#allocation8 + $0x290] sm:$0xf] }
 0x14b   :  { %v1604_v24 = vpop.f32.mrf.mxu2 }
 0x14c   :  { %2437 = vmatpush.bf16.msrb.mxu0 %v3852_v21  ;;  %v4298_v21 = vld [vmem:[#allocation8 + $0x268] sm:$0xf0]  ;;  %v4295_v24 = vld [vmem:[#allocation8 + $0x250] sm:$0xf0] }
 0x14d   :  { %v3856_v57 = vor.u32 %v4298_v21, %v3855_v20  ;;  %v3844_v25 = vor.u32 %v4295_v24, %v3843_v48 }
 0x14e   :  { %2471 = vmatpush.bf16.msrb.mxu2 %v3820_v22 }
 0x150   :  { %2438 = vmatpush.bf16.msrb.mxu0 %v3840_v27  ;;  %v1822_v27 = vperm.slane %v1820_v26, 0 }
 0x152   :  { %2472 = vmatpush.bf16.msrb.mxu2 %v3808_v28 }
 0x156   :  { %2473 = vmatpush.bf16.msrb.mxu2 %v3796_v31 }
 0x158   :  { %v1628_v37 = vpop.f32.mrf.mxu1 }
 0x159   :  { %2426 = vmatmul.bf16.vlgmr.msra.gmra.mxu2 %v1690_v14  ;;  %v1629_v47 = vadd.f32 %v1628_v37, %v1616_v43  ;;  %v1824_v43 = vperm.slane %v1820_v26, 2 }
 0x15a   :  { %2474 = vmatpush.bf16.msrb.mxu2 %v3784_v38 }
 0x15e   :  { %2475 = vmatpush.bf16.msrb.mxu2 %v3772_v23 }
 0x15f   :  { %v1667_v50 = vpop.f32.mrf.mxu0 }
 0x160   :  { %v1641_v53 = vpop.f32.mrf.mxu3  ;;  %v1630_v51 = vpop.f32.mrf.mxu1 }
 0x161   :  { %v1642_v58 = vadd.f32 %v1641_v53, %v1629_v47  ;;  %v4322_v53 = vld [vmem:[#allocation10 + $0x28] sm:$0xff] }
 0x162   :  { %2476 = vmatpush.bf16.msrb.mxu2 %v3760_v52  ;;  %2700 = vmatpush.bf16.msrb.mxu3 %v4322_v53  ;;  %v4321_v52 = vld [vmem:[#allocation10 + $0x20] sm:$0xff] }
 0x163   :  { %v1654_v54 = vpop.f32.mrf.mxu2 }
 0x164   :  { %v1655_v56 = vadd.f32 %v1654_v54, %v1642_v58  ;;  %v4332_v54 = vld [vmem:[#allocation10 + $0x78] sm:$0xff] }
 0x165   :  { %2711 = vmatpush.bf16.msra.mxu1 %v4332_v54 }
 0x166   :  { %v1668_v49 = vadd.f32 %v1667_v50, %v1655_v56  ;;  %2477 = vmatpush.bf16.msrb.mxu2 %v3748_v59  ;;  %2701 = vmatpush.bf16.msrb.mxu3 %v4321_v52  ;;  %v4331_v56 = vld [vmem:[#allocation10 + $0x70] sm:$0xff]  ;;  %v4318_v59 = vld [vmem:[#allocation10 + $0x8] sm:$0xff] }
 0x167   :  { %v1669_v34 = vpop.f32.mrf.mxu0 }
 0x168   :  { %v1643_v61 = vpop.f32.mrf.mxu3  ;;  %v1680_v62 = vpop.f32.mrf.mxu1 }
 0x169   :  { %v1681_v63 = vadd.f32 %v1680_v62, %v1668_v49  ;;  %2478 = vmatmul.bf16.vlgmr.msrb.gmra.mxu2 %v1690_v14  ;;  %v3880_v14 = vor.u32 %v4304_v13, %v3879_v12  ;;  %2712 = vmatpush.bf16.msra.mxu1 %v4331_v56  ;;  %v4330_v61 = vld [vmem:[#allocation10 + $0x68] sm:$0xff]  ;;  %v4317_v49 = vld [vmem:[#allocation10] sm:$0xff] }
 0x16a   :  { %2702 = vmatpush.bf16.msrb.mxu3 %v4320_v32  ;;  %v4329_v62 = vld [vmem:[#allocation10 + $0x60] sm:$0xff] }
 0x16b   :  { %v1656_v0 = vpop.f32.mrf.mxu2  ;;  %v1687_v2 = vmax.f32 %v1681_v63, 0.0  ;;  %v4328_v63 = vld [vmem:[#allocation10 + $0x58] sm:$0xff] }
 0x16c   :  { %v4340_v0 = vld [vmem:[#allocation10 + $0xb8] sm:$0xff] }
 0x16d   :  { %v1691_v17 = vpack.c.bf16 %v1687_v2, %v1687_v2  ;;  %2713 = vmatpush.bf16.msra.mxu1 %v4330_v61  ;;  %2724 = vmatpush.bf16.msra.mxu2 %v4340_v0  ;;  %v4339_v2 = vld [vmem:[#allocation10 + $0xb0] sm:$0xff] }
 0x16e   :  { %2703 = vmatpush.bf16.msrb.mxu3 %v4319_v55 }
 0x16f   :  { %2387 = vmatmul.bf16.vlgmr.msra.gmra.mxu0 %v1691_v17 }
 0x170   :  { %v1682_v5 = vpop.f32.mrf.mxu1  ;;  %2483 = vmatpush.bf16.msra.mxu0 %v3928_v3  ;;  %v4326_v3 = vld [vmem:[#allocation10 + $0x48] sm:$0xff] }
 0x171   :  { %2714 = vmatpush.bf16.msra.mxu1 %v4329_v62  ;;  %2725 = vmatpush.bf16.msra.mxu2 %v4339_v2  ;;  %v4337_v5 = vld [vmem:[#allocation10 + $0xa0] sm:$0xff] }
 0x172   :  { %2704 = vmatpush.bf16.msrb.mxu3 %v4318_v59 }
 0x174   :  { %2484 = vmatpush.bf16.msra.mxu0 %v3916_v6  ;;  %v4336_v6 = vld [vmem:[#allocation10 + $0x98] sm:$0xff] }
 0x175   :  { %2715 = vmatpush.bf16.msra.mxu1 %v4328_v63 }
 0x176   :  { %2705 = vmatpush.bf16.msrb.mxu3 %v4317_v49 }
 0x178   :  { %2485 = vmatpush.bf16.msra.mxu0 %v3904_v8 }
 0x179   :  { %2716 = vmatpush.bf16.msra.mxu1 %v4327_v40 }
 0x17c   :  { %2486 = vmatpush.bf16.msra.mxu0 %v3892_v11 }
 0x17d   :  { %2717 = vmatpush.bf16.msra.mxu1 %v4326_v3 }
 0x17f   :  { %2439 = vmatmul.bf16.vlgmr.msrb.gmra.mxu0 %v1691_v17 }
 0x180   :  { %v2349_v15 = vpop.f32.mrf.mxu3  ;;  %2487 = vmatpush.bf16.msra.mxu0 %v3880_v14 }
 0x181   :  { %v2350_v28 = vadd.f32 %v2349_v15, %v1822_v27  ;;  %2718 = vmatpush.bf16.msra.mxu1 %v4325_v4  ;;  %v4333_v15 = vld [vmem:[#allocation10 + $0x80] sm:$0xff] }
 0x184   :  { %2488 = vmatpush.bf16.msra.mxu0 %v3868_v19 }
 0x188   :  { %v2351_v22 = vpop.f32.mrf.mxu3  ;;  %2489 = vmatpush.bf16.msra.mxu0 %v3856_v57 }
 0x18b   :  { %v2362_v9 = vpop.f32.mrf.mxu1 }
 0x18c   :  { %2490 = vmatpush.bf16.msra.mxu0 %v3844_v25  ;;  %v4656_v29 = vadd.f32 %v2362_v9, %v2350_v28 }
 0x18f   :  { %2491 = vmatmul.bf16.vlgmr.msra.gmra.mxu0 %v1691_v17  ;;  %v4338_v17 = vld [vmem:[#allocation10 + $0xa8] sm:$0xff] }
 0x190   :  { %2726 = vmatpush.bf16.msra.mxu2 %v4338_v17 }
 0x193   :  { %v2364_v31 = vpop.f32.mrf.mxu1 }
 0x194   :  { %2727 = vmatpush.bf16.msra.mxu2 %v4337_v5 }
 0x198   :  { %2728 = vmatpush.bf16.msra.mxu2 %v4336_v6 }
 0x19c   :  { %v2414_v37 = vpop.f32.mrf.mxu1  ;;  %2729 = vmatpush.bf16.msra.mxu2 %v4335_v7 }
 0x1a0   :  { %v2401_v30 = vpop.f32.mrf.mxu3  ;;  %2730 = vmatpush.bf16.msra.mxu2 %v4334_v10 }
 0x1a1   :  { %v2402_v36 = vadd.f32 %v2401_v30, %v1823_v33 }
 0x1a3   :  { %v4658_v38 = vadd.f32 %v2414_v37, %v2402_v36 }
 0x1a4   :  { %v2416_v41 = vpop.f32.mrf.mxu1  ;;  %2731 = vmatpush.bf16.msra.mxu2 %v4333_v15 }
 0x1a8   :  { %v2403_v35 = vpop.f32.mrf.mxu3 }
 0x1a9   :  { %v4353_v35 = vld [vmem:[%s4677_s6] ss:$0 sm:$0xff] }
 0x1bc   :  { %v2466_v23 = vpop.f32.mrf.mxu1 }
 0x1c0   :  { %v2453_v44 = vpop.f32.mrf.mxu3 }
 0x1c1   :  { %v2454_v47 = vadd.f32 %v2453_v44, %v1824_v43 }
 0x1c3   :  { %v4660_v50 = vadd.f32 %v2466_v23, %v2454_v47 }
 0x1c4   :  { %v2468_v58 = vpop.f32.mrf.mxu1 }
 0x1c8   :  { %v2455_v51 = vpop.f32.mrf.mxu3 }
 0x1cc   :  { %v2375_v34 = vpop.f32.mrf.mxu2 }
 0x1cd   :  { %v2376_v8 = vadd.f32 %v2375_v34, %v4656_v29 }
 0x1d4   :  { %v2377_v1 = vpop.f32.mrf.mxu2 }
 0x1dc   :  { %v2427_v39 = vpop.f32.mrf.mxu2 }
 0x1dd   :  { %v2428_v19 = vadd.f32 %v2427_v39, %v4658_v38 }
 0x1e4   :  { %v2429_v60 = vpop.f32.mrf.mxu2 }
 0x1ec   :  { %v2388_v45 = vpop.f32.mrf.mxu0  ;;  %v2479_v12 = vpop.f32.mrf.mxu2 }
 0x1ed   :  { %v2389_v11 = vadd.f32 %v2388_v45, %v2376_v8  ;;  %v2480_v24 = vadd.f32 %v2479_v12, %v4660_v50 }
 0x1ef   :  { %v2496_v13 = vmax.f32 %v2389_v11, 0.0 }
 0x1f1   :  { %v2499_v14 = vpack.c.bf16 %v2496_v13, %v2496_v13 }
 0x1f3   :  { %2706 = vmatmul.bf16.vlgmr.msrb.gmra.mxu3 %v2499_v14 }
 0x1f4   :  { %v2390_v16 = vpop.f32.mrf.mxu0  ;;  %v2481_v18 = vpop.f32.mrf.mxu2 }
 0x1fc   :  { %v2440_v20 = vpop.f32.mrf.mxu0 }
 0x1fd   :  { %v2441_v21 = vadd.f32 %v2440_v20, %v2428_v19 }
 0x1ff   :  { %v2497_v22 = vmax.f32 %v2441_v21, 0.0 }
 0x201   :  { %v2500_v57 = vpack.c.bf16 %v2497_v22, %v2497_v22 }
 0x203   :  { %2719 = vmatmul.bf16.vlgmr.msra.gmra.mxu1 %v2500_v57 }
 0x204   :  { %v2442_v48 = vpop.f32.mrf.mxu0 }
 0x20c   :  { %v2492_v25 = vpop.f32.mrf.mxu0 }
 0x20d   :  { %v2493_v26 = vadd.f32 %v2492_v25, %v2480_v24 }
 0x20f   :  { %v2498_v27 = vmax.f32 %v2493_v26, 0.0 }
 0x211   :  { %v2501_v28 = vpack.c.bf16 %v2498_v27, %v2498_v27 }
 0x213   :  { %2732 = vmatmul.bf16.vlgmr.msra.gmra.mxu2 %v2501_v28 }
 0x214   :  { %v2494_v9 = vpop.f32.mrf.mxu0 }
 0x276   :  { %v2707_v29 = vpop.f32.mrf.mxu3 }
 0x277   :  { %v2708_v36 = vadd.f32 %v4353_v35, %v2707_v29 }
 0x27e   :  { %v2709_v30 = vpop.f32.mrf.mxu3 }
 0x280   :  { %v2720_v31 = vpop.f32.mrf.mxu1 }
 0x281   :  { %v2721_v37 = vadd.f32 %v2720_v31, %v2708_v36 }
 0x288   :  { %v2722_v33 = vpop.f32.mrf.mxu1 }
 0x296   :  { %v2733_v38 = vpop.f32.mrf.mxu2 }
 0x297   :  { %v2734_v41 = vadd.f32 %v2733_v38, %v2721_v37 }
 0x299   :  { %2737 = vst [vmem:[#allocation11] sm:$0xff] %v2734_v41 }
 0x29a   :  { %2748 = dma.vmem_to_hbm [thread:$0]  %s2744_s8, 128, %s2746_s11, [#allocation4]  }
 0x29e   :  { %v2735_v42 = vpop.f32.mrf.mxu2 }
 0x29f   :  { %4504 = dma.done.wait [#allocation4], 128  }
 0x2a0   :  { %4505 = vsyncadd [#allocation4], 4294967168 }
 0x2a1   :  { %2753 = vsyncpa [#allocation3], 1 }
 0x2a2   :  { %2754 = vsyncpa [#allocation6], 1 }
 0x2a3   :  { %2755 = vsyncpa [#allocation9], 1 }
 0x2a4   :  { %2756 = vsyncpa [#allocation4], 1 }

</bundles_post_ra>
